<compile_context>
chip_gen: v7x
topology: tpu7x:2x2x1
jax: 0.10.0
libtpu: 0.0.40
codegen_flags: <defaults>
</compile_context>

<pallas_src>
import functools

import jax
import jax.numpy as jnp
from jax import lax
from jax.experimental import pallas as pl
from jax.experimental.pallas import tpu as pltpu


# ---------------------------------------------------------------------------
# Fused kernel: all layers' input projections + time recurrences in one call.
# ---------------------------------------------------------------------------
def fused_lstm_kernel(x_ref, h0_ref, c0_ref, *refs, depth, hidden, seq, batch):
    """refs = [wih_0, whh_0, b_0, ..., wih_{L-1}, whh_{L-1}, b_{L-1},
               out_ref, hN_ref, cN_ref, gx_scratch, hbuf_scratch]."""
    w_refs = refs[:3 * depth]
    out_ref, hN_ref, cN_ref = refs[3 * depth:3 * depth + 3]
    gx_ref, hbuf_ref = refs[3 * depth + 3:]
    H = hidden

    for layer in range(depth):
        wih = w_refs[3 * layer][...]        # (d_in_l, 4H)
        whh = w_refs[3 * layer + 1][...]    # (H, 4H)
        b = w_refs[3 * layer + 2][...]      # (1, 4H)

        # Hoisted input projection + bias for this layer: ONE big MXU matmul
        # (M = T*B rows), entirely off the serial h->h chain.
        xin = x_ref[...] if layer == 0 else hbuf_ref[...]      # (T*B, d_in_l)
        gx_ref[...] = (
            jnp.dot(xin, wih, preferred_element_type=jnp.float32) + b
        )

        is_last = layer == depth - 1

        def step(t, carry, whh=whh, is_last=is_last):
            h, c = carry
            row = pl.multiple_of(t * batch, batch)
            # Only matmul on the serial path: h @ W_hh^T.
            gates = gx_ref[pl.ds(row, batch), :] + jnp.dot(
                h, whh, preferred_element_type=jnp.float32)
            # Two full-vreg EUP ops instead of four quarter-width ones; the four
            # gates are then static lane slices (PyTorch order i, f, g, o).
            sig = jax.nn.sigmoid(gates)
            th = jnp.tanh(gates)
            i_g = sig[:, 0 * H:1 * H]
            f_g = sig[:, 1 * H:2 * H]
            g_g = th[:, 2 * H:3 * H]
            o_g = sig[:, 3 * H:4 * H]
            c_new = f_g * c + i_g * g_g
            h_new = o_g * jnp.tanh(c_new)
            if is_last:
                out_ref[t] = h_new                      # final layer -> real output
            else:
                hbuf_ref[pl.ds(row, batch), :] = h_new  # feeds the next layer in VMEM
            return h_new, c_new

        h, c = lax.fori_loop(0, seq, step,
                             (h0_ref[layer], c0_ref[layer]), unroll=8)
        hN_ref[layer] = h
        cN_ref[layer] = c


# ---------------------------------------------------------------------------
# Wrapper
# ---------------------------------------------------------------------------
def lstm_forward(inputs, hidden, params):
    """Equivalent of LSTMForDemonstration.forward(inputs, hidden).

    inputs: (T, B, D_in) f32
    hidden: (h0, c0), each (depth, B, H) f32
    params: list of per-layer (W_ih^T [d_in,4H], W_hh^T [H,4H], bias [1,4H]=b_ih+b_hh)
    """
    h0, c0 = hidden
    T, B, D_in = inputs.shape
    depth = len(params)
    H = params[0][1].shape[0]
    G = 4 * H

    x2d = inputs.reshape(T * B, D_in)   # flatten in JAX (free) -> no in-kernel reshape

    weight_args = []
    in_specs = [
        pl.BlockSpec((T * B, D_in), lambda i: (0, 0)),
        pl.BlockSpec((depth, B, H), lambda i: (0, 0, 0)),
        pl.BlockSpec((depth, B, H), lambda i: (0, 0, 0)),
    ]
    for wih_t, whh_t, bias in params:
        weight_args += [wih_t, whh_t, bias]
        in_specs += [
            pl.BlockSpec(wih_t.shape, lambda i: (0, 0)),
            pl.BlockSpec(whh_t.shape, lambda i: (0, 0)),
            pl.BlockSpec(bias.shape, lambda i: (0, 0)),
        ]

    kernel = functools.partial(
        fused_lstm_kernel, depth=depth, hidden=H, seq=T, batch=B)

    out, hN, cN = pl.pallas_call(
        kernel,
        out_shape=(
            jax.ShapeDtypeStruct((T, B, H), jnp.float32),
            jax.ShapeDtypeStruct((depth, B, H), jnp.float32),
            jax.ShapeDtypeStruct((depth, B, H), jnp.float32),
        ),
        grid_spec=pltpu.PrefetchScalarGridSpec(
            num_scalar_prefetch=0,
            grid=(1,),                       # whole forward in one grid step
            in_specs=in_specs,
            out_specs=[
                pl.BlockSpec((T, B, H), lambda i: (0, 0, 0)),
                pl.BlockSpec((depth, B, H), lambda i: (0, 0, 0)),
                pl.BlockSpec((depth, B, H), lambda i: (0, 0, 0)),
            ],
            scratch_shapes=[
                pltpu.VMEM((T * B, G), jnp.float32),   # gates_x for current layer
                pltpu.VMEM((T * B, H), jnp.float32),   # inter-layer hidden states
            ],
        ),
        compiler_params=pltpu.CompilerParams(
            dimension_semantics=("arbitrary",)),
    )(x2d, h0, c0, *weight_args)
    return out, (hN, cN)


def init_lstm_params(key, in_dim, hidden, depth):
    """nn.LSTM-shaped params (gate order i,f,g,o).

    Returns per-layer (W_ih^T [d_in,4H], W_hh^T [H,4H], bias [1,4H] = b_ih+b_hh).
    """
    params = []
    k = 1.0 / jnp.sqrt(jnp.float32(hidden))
    for layer_idx in range(depth):
        d_in = in_dim if layer_idx == 0 else hidden
        key, k1, k2, k3, k4 = jax.random.split(key, 5)
        w_ih = jax.random.uniform(k1, (4 * hidden, d_in), jnp.float32, -k, k)
        w_hh = jax.random.uniform(k2, (4 * hidden, hidden), jnp.float32, -k, k)
        b_ih = jax.random.uniform(k3, (4 * hidden,), jnp.float32, -k, k)
        b_hh = jax.random.uniform(k4, (4 * hidden,), jnp.float32, -k, k)
        params.append((w_ih.T, w_hh.T, (b_ih + b_hh).reshape(1, 4 * hidden)))
    return params


def lstm_reference(inputs, hidden, params):
    """Pure-JAX reference (same math as torch.nn.LSTM forward)."""
    h0, c0 = hidden
    layer_in = inputs
    h_fin, c_fin = [], []
    for layer_idx, (wih_t, whh_t, bias) in enumerate(params):
        H = whh_t.shape[0]

        def step(carry, x_t, wih_t=wih_t, whh_t=whh_t, bias=bias, H=H):
            h, c = carry
            gates = x_t @ wih_t + h @ whh_t + bias[0]
            i = jax.nn.sigmoid(gates[:, 0 * H:1 * H])
            f = jax.nn.sigmoid(gates[:, 1 * H:2 * H])
            g = jnp.tanh(gates[:, 2 * H:3 * H])
            o = jax.nn.sigmoid(gates[:, 3 * H:4 * H])
            c = f * c + i * g
            h = o * jnp.tanh(c)
            return (h, c), h

        (hT, cT), outs = lax.scan(step, (h0[layer_idx], c0[layer_idx]), layer_in)
        layer_in = outs
        h_fin.append(hT)
        c_fin.append(cT)
    return layer_in, (jnp.stack(h_fin, 0), jnp.stack(c_fin, 0))


if __name__ == "__main__":
    IN_DIM = 32      # in_dim
    HIDDEN = 32      # out_dim
    DEPTH = 2        # depth
    SEQ = 8
    BATCH = 8

    key = jax.random.PRNGKey(0)
    key, kx, kh, kc, kp = jax.random.split(key, 5)

    inputs = jax.random.normal(kx, (SEQ, BATCH, IN_DIM), jnp.float32)
    h0 = jax.random.normal(kh, (DEPTH, BATCH, HIDDEN), jnp.float32)
    c0 = jax.random.normal(kc, (DEPTH, BATCH, HIDDEN), jnp.float32)
    params = init_lstm_params(kp, IN_DIM, HIDDEN, DEPTH)

    out, (h_n, c_n) = lstm_forward(inputs, (h0, c0), params)
    jax.block_until_ready((out, h_n, c_n))

    # Sanity-check against the pure-JAX reference.
    out_ref, (h_ref, c_ref) = lstm_reference(inputs, (h0, c0), params)
    assert out.shape == (SEQ, BATCH, HIDDEN)
    assert h_n.shape == (DEPTH, BATCH, HIDDEN)
    assert c_n.shape == (DEPTH, BATCH, HIDDEN)
    assert jnp.allclose(out, out_ref, atol=1e-5, rtol=1e-5)
    assert jnp.allclose(h_n, h_ref, atol=1e-5, rtol=1e-5)
    assert jnp.allclose(c_n, c_ref, atol=1e-5, rtol=1e-5)

    print("KERNEL_OK")
</pallas_src>

<mosaic_0001>
module attributes {stable_mosaic.version = 11 : i64} {
  func.func @fused_lstm_kernel(%arg0: i32, %arg1: memref<64x32xf32, #tpu.memory_space<vmem>>, %arg2: memref<2x8x32xf32, #tpu.memory_space<vmem>>, %arg3: memref<2x8x32xf32, #tpu.memory_space<vmem>>, %arg4: memref<32x128xf32, #tpu.memory_space<vmem>>, %arg5: memref<32x128xf32, #tpu.memory_space<vmem>>, %arg6: memref<1x128xf32, #tpu.memory_space<vmem>>, %arg7: memref<32x128xf32, #tpu.memory_space<vmem>>, %arg8: memref<32x128xf32, #tpu.memory_space<vmem>>, %arg9: memref<1x128xf32, #tpu.memory_space<vmem>>, %arg10: memref<8x8x32xf32, #tpu.memory_space<vmem>>, %arg11: memref<2x8x32xf32, #tpu.memory_space<vmem>>, %arg12: memref<2x8x32xf32, #tpu.memory_space<vmem>>, %arg13: memref<64x128xf32, #tpu.memory_space<vmem>>, %arg14: memref<64x32xf32, #tpu.memory_space<vmem>>) attributes {dimension_semantics = [#tpu.dimension_semantics<arbitrary>], iteration_bounds = array<i64: 1>, scalar_prefetch = 0 : i64, scratch_operands = 2 : i64, tpu.core_type = #tpu.core_type<tc>, window_params = [{pipeline_mode = #tpu.pipeline_mode<synchronous>, transform_indices = @transform_0, window_bounds = array<i64: 64, 32>}, {pipeline_mode = #tpu.pipeline_mode<synchronous>, transform_indices = @transform_1, window_bounds = array<i64: 2, 8, 32>}, {pipeline_mode = #tpu.pipeline_mode<synchronous>, transform_indices = @transform_2, window_bounds = array<i64: 2, 8, 32>}, {pipeline_mode = #tpu.pipeline_mode<synchronous>, transform_indices = @transform_3, window_bounds = array<i64: 32, 128>}, {pipeline_mode = #tpu.pipeline_mode<synchronous>, transform_indices = @transform_4, window_bounds = array<i64: 32, 128>}, {pipeline_mode = #tpu.pipeline_mode<synchronous>, transform_indices = @transform_5, window_bounds = array<i64: 1, 128>}, {pipeline_mode = #tpu.pipeline_mode<synchronous>, transform_indices = @transform_6, window_bounds = array<i64: 32, 128>}, {pipeline_mode = #tpu.pipeline_mode<synchronous>, transform_indices = @transform_7, window_bounds = array<i64: 32, 128>}, {pipeline_mode = #tpu.pipeline_mode<synchronous>, transform_indices = @transform_8, window_bounds = array<i64: 1, 128>}, {pipeline_mode = #tpu.pipeline_mode<synchronous>, transform_indices = @transform_9, window_bounds = array<i64: 8, 8, 32>}, {pipeline_mode = #tpu.pipeline_mode<synchronous>, transform_indices = @transform_10, window_bounds = array<i64: 2, 8, 32>}, {pipeline_mode = #tpu.pipeline_mode<synchronous>, transform_indices = @transform_11, window_bounds = array<i64: 2, 8, 32>}]} {
    %c0 = arith.constant 0 : index
    %c0_0 = arith.constant 0 : index
    %0 = vector.load %arg4[%c0, %c0_0] : memref<32x128xf32, #tpu.memory_space<vmem>>, vector<32x128xf32>
    %c0_1 = arith.constant 0 : index
    %c0_2 = arith.constant 0 : index
    %1 = vector.load %arg5[%c0_1, %c0_2] : memref<32x128xf32, #tpu.memory_space<vmem>>, vector<32x128xf32>
    %c0_3 = arith.constant 0 : index
    %c0_4 = arith.constant 0 : index
    %2 = vector.load %arg6[%c0_3, %c0_4] : memref<1x128xf32, #tpu.memory_space<vmem>>, vector<1x128xf32>
    %c0_5 = arith.constant 0 : index
    %c0_6 = arith.constant 0 : index
    %3 = vector.load %arg1[%c0_5, %c0_6] : memref<64x32xf32, #tpu.memory_space<vmem>>, vector<64x32xf32>
    %cst = arith.constant dense<0.000000e+00> : vector<64x128xf32>
    %4 = tpu.matmul %3, %0, %cst {dimension_numbers = #tpu.dot_dimension_numbers<[1], [0], [0], [1], [0, 0, 1, 1], [], []>} : vector<64x32xf32>, vector<32x128xf32>, vector<64x128xf32> -> vector<64x128xf32>
    %5 = vector.broadcast %2 : vector<1x128xf32> to vector<64x128xf32>
    %6 = arith.addf %4, %5 : vector<64x128xf32>
    %c0_7 = arith.constant 0 : index
    %c0_8 = arith.constant 0 : index
    %7 = vector.load %arg13[%c0_7, %c0_8] : memref<64x128xf32, #tpu.memory_space<vmem>>, vector<64x128xf32>
    tpu.vector_store %arg13[%c0_7, %c0_8], %6 {strides = array<i32>} : memref<64x128xf32, #tpu.memory_space<vmem>>, vector<64x128xf32>,
    %c0_9 = arith.constant 0 : index
    %c0_10 = arith.constant 0 : index
    %c0_11 = arith.constant 0 : index
    %8 = vector.load %arg2[%c0_9, %c0_10, %c0_11] : memref<2x8x32xf32, #tpu.memory_space<vmem>>, vector<1x8x32xf32>
    %9 = vector.shape_cast %8 : vector<1x8x32xf32> to vector<8x32xf32>
    %c0_12 = arith.constant 0 : index
    %c0_13 = arith.constant 0 : index
    %c0_14 = arith.constant 0 : index
    %10 = vector.load %arg3[%c0_12, %c0_13, %c0_14] : memref<2x8x32xf32, #tpu.memory_space<vmem>>, vector<1x8x32xf32>
    %11 = vector.shape_cast %10 : vector<1x8x32xf32> to vector<8x32xf32>
    %c0_i32 = arith.constant 0 : i32
    %c8_i32 = arith.constant 8 : i32
    %12 = arith.muli %c0_i32, %c8_i32 : i32
    %13 = tpu.assume_multiple %12, 8 : i32
    %14 = arith.index_cast %13 : i32 to index
    %c0_15 = arith.constant 0 : index
    %15 = vector.load %arg13[%14, %c0_15] : memref<64x128xf32, #tpu.memory_space<vmem>>, vector<8x128xf32>
    %cst_16 = arith.constant dense<0.000000e+00> : vector<8x128xf32>
    %16 = tpu.matmul %9, %1, %cst_16 {dimension_numbers = #tpu.dot_dimension_numbers<[1], [0], [0], [1], [0, 0, 1, 1], [], []>} : vector<8x32xf32>, vector<32x128xf32>, vector<8x128xf32> -> vector<8x128xf32>
    %17 = arith.addf %15, %16 : vector<8x128xf32>
    %18 = arith.negf %17 : vector<8x128xf32>
    %19 = math.exp %18 : vector<8x128xf32>
    %cst_17 = arith.constant 1.000000e+00 : f32
    %20 = vector.broadcast %cst_17 : f32 to vector<8x128xf32>
    %21 = arith.addf %20, %19 : vector<8x128xf32>
    %22 = arith.divf %20, %21 : vector<8x128xf32>
    %23 = math.tanh %17 : vector<8x128xf32>
    %24 = vector.extract_strided_slice %22 {offsets = [0, 0], sizes = [8, 32], strides = [1, 1]} : vector<8x128xf32> to vector<8x32xf32>
    %25 = vector.extract_strided_slice %22 {offsets = [0, 32], sizes = [8, 32], strides = [1, 1]} : vector<8x128xf32> to vector<8x32xf32>
    %26 = vector.extract_strided_slice %23 {offsets = [0, 64], sizes = [8, 32], strides = [1, 1]} : vector<8x128xf32> to vector<8x32xf32>
    %27 = vector.extract_strided_slice %22 {offsets = [0, 96], sizes = [8, 32], strides = [1, 1]} : vector<8x128xf32> to vector<8x32xf32>
    %28 = arith.mulf %25, %11 : vector<8x32xf32>
    %29 = arith.mulf %24, %26 : vector<8x32xf32>
    %30 = arith.addf %28, %29 : vector<8x32xf32>
    %31 = math.tanh %30 : vector<8x32xf32>
    %32 = arith.mulf %27, %31 : vector<8x32xf32>
    %33 = arith.index_cast %13 : i32 to index
    %c0_18 = arith.constant 0 : index
    %34 = vector.load %arg14[%33, %c0_18] : memref<64x32xf32, #tpu.memory_space<vmem>>, vector<8x32xf32>
    tpu.vector_store %arg14[%33, %c0_18], %32 {strides = array<i32>} : memref<64x32xf32, #tpu.memory_space<vmem>>, vector<8x32xf32>,
    %c1_i32 = arith.constant 1 : i32
    %c8_i32_19 = arith.constant 8 : i32
    %35 = arith.muli %c1_i32, %c8_i32_19 : i32
    %36 = tpu.assume_multiple %35, 8 : i32
    %37 = arith.index_cast %36 : i32 to index
    %c0_20 = arith.constant 0 : index
    %38 = vector.load %arg13[%37, %c0_20] : memref<64x128xf32, #tpu.memory_space<vmem>>, vector<8x128xf32>
    %cst_21 = arith.constant dense<0.000000e+00> : vector<8x128xf32>
    %39 = tpu.matmul %32, %1, %cst_21 {dimension_numbers = #tpu.dot_dimension_numbers<[1], [0], [0], [1], [0, 0, 1, 1], [], []>} : vector<8x32xf32>, vector<32x128xf32>, vector<8x128xf32> -> vector<8x128xf32>
    %40 = arith.addf %38, %39 : vector<8x128xf32>
    %41 = arith.negf %40 : vector<8x128xf32>
    %42 = math.exp %41 : vector<8x128xf32>
    %cst_22 = arith.constant 1.000000e+00 : f32
    %43 = vector.broadcast %cst_22 : f32 to vector<8x128xf32>
    %44 = arith.addf %43, %42 : vector<8x128xf32>
    %45 = arith.divf %43, %44 : vector<8x128xf32>
    %46 = math.tanh %40 : vector<8x128xf32>
    %47 = vector.extract_strided_slice %45 {offsets = [0, 0], sizes = [8, 32], strides = [1, 1]} : vector<8x128xf32> to vector<8x32xf32>
    %48 = vector.extract_strided_slice %45 {offsets = [0, 32], sizes = [8, 32], strides = [1, 1]} : vector<8x128xf32> to vector<8x32xf32>
    %49 = vector.extract_strided_slice %46 {offsets = [0, 64], sizes = [8, 32], strides = [1, 1]} : vector<8x128xf32> to vector<8x32xf32>
    %50 = vector.extract_strided_slice %45 {offsets = [0, 96], sizes = [8, 32], strides = [1, 1]} : vector<8x128xf32> to vector<8x32xf32>
    %51 = arith.mulf %48, %30 : vector<8x32xf32>
    %52 = arith.mulf %47, %49 : vector<8x32xf32>
    %53 = arith.addf %51, %52 : vector<8x32xf32>
    %54 = math.tanh %53 : vector<8x32xf32>
    %55 = arith.mulf %50, %54 : vector<8x32xf32>
    %56 = arith.index_cast %36 : i32 to index
    %c0_23 = arith.constant 0 : index
    %57 = vector.load %arg14[%56, %c0_23] : memref<64x32xf32, #tpu.memory_space<vmem>>, vector<8x32xf32>
    tpu.vector_store %arg14[%56, %c0_23], %55 {strides = array<i32>} : memref<64x32xf32, #tpu.memory_space<vmem>>, vector<8x32xf32>,
    %c2_i32 = arith.constant 2 : i32
    %c8_i32_24 = arith.constant 8 : i32
    %58 = arith.muli %c2_i32, %c8_i32_24 : i32
    %59 = tpu.assume_multiple %58, 8 : i32
    %60 = arith.index_cast %59 : i32 to index
    %c0_25 = arith.constant 0 : index
    %61 = vector.load %arg13[%60, %c0_25] : memref<64x128xf32, #tpu.memory_space<vmem>>, vector<8x128xf32>
    %cst_26 = arith.constant dense<0.000000e+00> : vector<8x128xf32>
    %62 = tpu.matmul %55, %1, %cst_26 {dimension_numbers = #tpu.dot_dimension_numbers<[1], [0], [0], [1], [0, 0, 1, 1], [], []>} : vector<8x32xf32>, vector<32x128xf32>, vector<8x128xf32> -> vector<8x128xf32>
    %63 = arith.addf %61, %62 : vector<8x128xf32>
    %64 = arith.negf %63 : vector<8x128xf32>
    %65 = math.exp %64 : vector<8x128xf32>
    %cst_27 = arith.constant 1.000000e+00 : f32
    %66 = vector.broadcast %cst_27 : f32 to vector<8x128xf32>
    %67 = arith.addf %66, %65 : vector<8x128xf32>
    %68 = arith.divf %66, %67 : vector<8x128xf32>
    %69 = math.tanh %63 : vector<8x128xf32>
    %70 = vector.extract_strided_slice %68 {offsets = [0, 0], sizes = [8, 32], strides = [1, 1]} : vector<8x128xf32> to vector<8x32xf32>
    %71 = vector.extract_strided_slice %68 {offsets = [0, 32], sizes = [8, 32], strides = [1, 1]} : vector<8x128xf32> to vector<8x32xf32>
    %72 = vector.extract_strided_slice %69 {offsets = [0, 64], sizes = [8, 32], strides = [1, 1]} : vector<8x128xf32> to vector<8x32xf32>
    %73 = vector.extract_strided_slice %68 {offsets = [0, 96], sizes = [8, 32], strides = [1, 1]} : vector<8x128xf32> to vector<8x32xf32>
    %74 = arith.mulf %71, %53 : vector<8x32xf32>
    %75 = arith.mulf %70, %72 : vector<8x32xf32>
    %76 = arith.addf %74, %75 : vector<8x32xf32>
    %77 = math.tanh %76 : vector<8x32xf32>
    %78 = arith.mulf %73, %77 : vector<8x32xf32>
    %79 = arith.index_cast %59 : i32 to index
    %c0_28 = arith.constant 0 : index
    %80 = vector.load %arg14[%79, %c0_28] : memref<64x32xf32, #tpu.memory_space<vmem>>, vector<8x32xf32>
    tpu.vector_store %arg14[%79, %c0_28], %78 {strides = array<i32>} : memref<64x32xf32, #tpu.memory_space<vmem>>, vector<8x32xf32>,
    %c3_i32 = arith.constant 3 : i32
    %c8_i32_29 = arith.constant 8 : i32
    %81 = arith.muli %c3_i32, %c8_i32_29 : i32
    %82 = tpu.assume_multiple %81, 8 : i32
    %83 = arith.index_cast %82 : i32 to index
    %c0_30 = arith.constant 0 : index
    %84 = vector.load %arg13[%83, %c0_30] : memref<64x128xf32, #tpu.memory_space<vmem>>, vector<8x128xf32>
    %cst_31 = arith.constant dense<0.000000e+00> : vector<8x128xf32>
    %85 = tpu.matmul %78, %1, %cst_31 {dimension_numbers = #tpu.dot_dimension_numbers<[1], [0], [0], [1], [0, 0, 1, 1], [], []>} : vector<8x32xf32>, vector<32x128xf32>, vector<8x128xf32> -> vector<8x128xf32>
    %86 = arith.addf %84, %85 : vector<8x128xf32>
    %87 = arith.negf %86 : vector<8x128xf32>
    %88 = math.exp %87 : vector<8x128xf32>
    %cst_32 = arith.constant 1.000000e+00 : f32
    %89 = vector.broadcast %cst_32 : f32 to vector<8x128xf32>
    %90 = arith.addf %89, %88 : vector<8x128xf32>
    %91 = arith.divf %89, %90 : vector<8x128xf32>
    %92 = math.tanh %86 : vector<8x128xf32>
    %93 = vector.extract_strided_slice %91 {offsets = [0, 0], sizes = [8, 32], strides = [1, 1]} : vector<8x128xf32> to vector<8x32xf32>
    %94 = vector.extract_strided_slice %91 {offsets = [0, 32], sizes = [8, 32], strides = [1, 1]} : vector<8x128xf32> to vector<8x32xf32>
    %95 = vector.extract_strided_slice %92 {offsets = [0, 64], sizes = [8, 32], strides = [1, 1]} : vector<8x128xf32> to vector<8x32xf32>
    %96 = vector.extract_strided_slice %91 {offsets = [0, 96], sizes = [8, 32], strides = [1, 1]} : vector<8x128xf32> to vector<8x32xf32>
    %97 = arith.mulf %94, %76 : vector<8x32xf32>
    %98 = arith.mulf %93, %95 : vector<8x32xf32>
    %99 = arith.addf %97, %98 : vector<8x32xf32>
    %100 = math.tanh %99 : vector<8x32xf32>
    %101 = arith.mulf %96, %100 : vector<8x32xf32>
    %102 = arith.index_cast %82 : i32 to index
    %c0_33 = arith.constant 0 : index
    %103 = vector.load %arg14[%102, %c0_33] : memref<64x32xf32, #tpu.memory_space<vmem>>, vector<8x32xf32>
    tpu.vector_store %arg14[%102, %c0_33], %101 {strides = array<i32>} : memref<64x32xf32, #tpu.memory_space<vmem>>, vector<8x32xf32>,
    %c4_i32 = arith.constant 4 : i32
    %c8_i32_34 = arith.constant 8 : i32
    %104 = arith.muli %c4_i32, %c8_i32_34 : i32
    %105 = tpu.assume_multiple %104, 8 : i32
    %106 = arith.index_cast %105 : i32 to index
    %c0_35 = arith.constant 0 : index
    %107 = vector.load %arg13[%106, %c0_35] : memref<64x128xf32, #tpu.memory_space<vmem>>, vector<8x128xf32>
    %cst_36 = arith.constant dense<0.000000e+00> : vector<8x128xf32>
    %108 = tpu.matmul %101, %1, %cst_36 {dimension_numbers = #tpu.dot_dimension_numbers<[1], [0], [0], [1], [0, 0, 1, 1], [], []>} : vector<8x32xf32>, vector<32x128xf32>, vector<8x128xf32> -> vector<8x128xf32>
    %109 = arith.addf %107, %108 : vector<8x128xf32>
    %110 = arith.negf %109 : vector<8x128xf32>
    %111 = math.exp %110 : vector<8x128xf32>
    %cst_37 = arith.constant 1.000000e+00 : f32
    %112 = vector.broadcast %cst_37 : f32 to vector<8x128xf32>
    %113 = arith.addf %112, %111 : vector<8x128xf32>
    %114 = arith.divf %112, %113 : vector<8x128xf32>
    %115 = math.tanh %109 : vector<8x128xf32>
    %116 = vector.extract_strided_slice %114 {offsets = [0, 0], sizes = [8, 32], strides = [1, 1]} : vector<8x128xf32> to vector<8x32xf32>
    %117 = vector.extract_strided_slice %114 {offsets = [0, 32], sizes = [8, 32], strides = [1, 1]} : vector<8x128xf32> to vector<8x32xf32>
    %118 = vector.extract_strided_slice %115 {offsets = [0, 64], sizes = [8, 32], strides = [1, 1]} : vector<8x128xf32> to vector<8x32xf32>
    %119 = vector.extract_strided_slice %114 {offsets = [0, 96], sizes = [8, 32], strides = [1, 1]} : vector<8x128xf32> to vector<8x32xf32>
    %120 = arith.mulf %117, %99 : vector<8x32xf32>
    %121 = arith.mulf %116, %118 : vector<8x32xf32>
    %122 = arith.addf %120, %121 : vector<8x32xf32>
    %123 = math.tanh %122 : vector<8x32xf32>
    %124 = arith.mulf %119, %123 : vector<8x32xf32>
    %125 = arith.index_cast %105 : i32 to index
    %c0_38 = arith.constant 0 : index
    %126 = vector.load %arg14[%125, %c0_38] : memref<64x32xf32, #tpu.memory_space<vmem>>, vector<8x32xf32>
    tpu.vector_store %arg14[%125, %c0_38], %124 {strides = array<i32>} : memref<64x32xf32, #tpu.memory_space<vmem>>, vector<8x32xf32>,
    %c5_i32 = arith.constant 5 : i32
    %c8_i32_39 = arith.constant 8 : i32
    %127 = arith.muli %c5_i32, %c8_i32_39 : i32
    %128 = tpu.assume_multiple %127, 8 : i32
    %129 = arith.index_cast %128 : i32 to index
    %c0_40 = arith.constant 0 : index
    %130 = vector.load %arg13[%129, %c0_40] : memref<64x128xf32, #tpu.memory_space<vmem>>, vector<8x128xf32>
    %cst_41 = arith.constant dense<0.000000e+00> : vector<8x128xf32>
    %131 = tpu.matmul %124, %1, %cst_41 {dimension_numbers = #tpu.dot_dimension_numbers<[1], [0], [0], [1], [0, 0, 1, 1], [], []>} : vector<8x32xf32>, vector<32x128xf32>, vector<8x128xf32> -> vector<8x128xf32>
    %132 = arith.addf %130, %131 : vector<8x128xf32>
    %133 = arith.negf %132 : vector<8x128xf32>
    %134 = math.exp %133 : vector<8x128xf32>
    %cst_42 = arith.constant 1.000000e+00 : f32
    %135 = vector.broadcast %cst_42 : f32 to vector<8x128xf32>
    %136 = arith.addf %135, %134 : vector<8x128xf32>
    %137 = arith.divf %135, %136 : vector<8x128xf32>
    %138 = math.tanh %132 : vector<8x128xf32>
    %139 = vector.extract_strided_slice %137 {offsets = [0, 0], sizes = [8, 32], strides = [1, 1]} : vector<8x128xf32> to vector<8x32xf32>
    %140 = vector.extract_strided_slice %137 {offsets = [0, 32], sizes = [8, 32], strides = [1, 1]} : vector<8x128xf32> to vector<8x32xf32>
    %141 = vector.extract_strided_slice %138 {offsets = [0, 64], sizes = [8, 32], strides = [1, 1]} : vector<8x128xf32> to vector<8x32xf32>
    %142 = vector.extract_strided_slice %137 {offsets = [0, 96], sizes = [8, 32], strides = [1, 1]} : vector<8x128xf32> to vector<8x32xf32>
    %143 = arith.mulf %140, %122 : vector<8x32xf32>
    %144 = arith.mulf %139, %141 : vector<8x32xf32>
    %145 = arith.addf %143, %144 : vector<8x32xf32>
    %146 = math.tanh %145 : vector<8x32xf32>
    %147 = arith.mulf %142, %146 : vector<8x32xf32>
    %148 = arith.index_cast %128 : i32 to index
    %c0_43 = arith.constant 0 : index
    %149 = vector.load %arg14[%148, %c0_43] : memref<64x32xf32, #tpu.memory_space<vmem>>, vector<8x32xf32>
    tpu.vector_store %arg14[%148, %c0_43], %147 {strides = array<i32>} : memref<64x32xf32, #tpu.memory_space<vmem>>, vector<8x32xf32>,
    %c6_i32 = arith.constant 6 : i32
    %c8_i32_44 = arith.constant 8 : i32
    %150 = arith.muli %c6_i32, %c8_i32_44 : i32
    %151 = tpu.assume_multiple %150, 8 : i32
    %152 = arith.index_cast %151 : i32 to index
    %c0_45 = arith.constant 0 : index
    %153 = vector.load %arg13[%152, %c0_45] : memref<64x128xf32, #tpu.memory_space<vmem>>, vector<8x128xf32>
    %cst_46 = arith.constant dense<0.000000e+00> : vector<8x128xf32>
    %154 = tpu.matmul %147, %1, %cst_46 {dimension_numbers = #tpu.dot_dimension_numbers<[1], [0], [0], [1], [0, 0, 1, 1], [], []>} : vector<8x32xf32>, vector<32x128xf32>, vector<8x128xf32> -> vector<8x128xf32>
    %155 = arith.addf %153, %154 : vector<8x128xf32>
    %156 = arith.negf %155 : vector<8x128xf32>
    %157 = math.exp %156 : vector<8x128xf32>
    %cst_47 = arith.constant 1.000000e+00 : f32
    %158 = vector.broadcast %cst_47 : f32 to vector<8x128xf32>
    %159 = arith.addf %158, %157 : vector<8x128xf32>
    %160 = arith.divf %158, %159 : vector<8x128xf32>
    %161 = math.tanh %155 : vector<8x128xf32>
    %162 = vector.extract_strided_slice %160 {offsets = [0, 0], sizes = [8, 32], strides = [1, 1]} : vector<8x128xf32> to vector<8x32xf32>
    %163 = vector.extract_strided_slice %160 {offsets = [0, 32], sizes = [8, 32], strides = [1, 1]} : vector<8x128xf32> to vector<8x32xf32>
    %164 = vector.extract_strided_slice %161 {offsets = [0, 64], sizes = [8, 32], strides = [1, 1]} : vector<8x128xf32> to vector<8x32xf32>
    %165 = vector.extract_strided_slice %160 {offsets = [0, 96], sizes = [8, 32], strides = [1, 1]} : vector<8x128xf32> to vector<8x32xf32>
    %166 = arith.mulf %163, %145 : vector<8x32xf32>
    %167 = arith.mulf %162, %164 : vector<8x32xf32>
    %168 = arith.addf %166, %167 : vector<8x32xf32>
    %169 = math.tanh %168 : vector<8x32xf32>
    %170 = arith.mulf %165, %169 : vector<8x32xf32>
    %171 = arith.index_cast %151 : i32 to index
    %c0_48 = arith.constant 0 : index
    %172 = vector.load %arg14[%171, %c0_48] : memref<64x32xf32, #tpu.memory_space<vmem>>, vector<8x32xf32>
    tpu.vector_store %arg14[%171, %c0_48], %170 {strides = array<i32>} : memref<64x32xf32, #tpu.memory_space<vmem>>, vector<8x32xf32>,
    %c7_i32 = arith.constant 7 : i32
    %c8_i32_49 = arith.constant 8 : i32
    %173 = arith.muli %c7_i32, %c8_i32_49 : i32
    %174 = tpu.assume_multiple %173, 8 : i32
    %175 = arith.index_cast %174 : i32 to index
    %c0_50 = arith.constant 0 : index
    %176 = vector.load %arg13[%175, %c0_50] : memref<64x128xf32, #tpu.memory_space<vmem>>, vector<8x128xf32>
    %cst_51 = arith.constant dense<0.000000e+00> : vector<8x128xf32>
    %177 = tpu.matmul %170, %1, %cst_51 {dimension_numbers = #tpu.dot_dimension_numbers<[1], [0], [0], [1], [0, 0, 1, 1], [], []>} : vector<8x32xf32>, vector<32x128xf32>, vector<8x128xf32> -> vector<8x128xf32>
    %178 = arith.addf %176, %177 : vector<8x128xf32>
    %179 = arith.negf %178 : vector<8x128xf32>
    %180 = math.exp %179 : vector<8x128xf32>
    %cst_52 = arith.constant 1.000000e+00 : f32
    %181 = vector.broadcast %cst_52 : f32 to vector<8x128xf32>
    %182 = arith.addf %181, %180 : vector<8x128xf32>
    %183 = arith.divf %181, %182 : vector<8x128xf32>
    %184 = math.tanh %178 : vector<8x128xf32>
    %185 = vector.extract_strided_slice %183 {offsets = [0, 0], sizes = [8, 32], strides = [1, 1]} : vector<8x128xf32> to vector<8x32xf32>
    %186 = vector.extract_strided_slice %183 {offsets = [0, 32], sizes = [8, 32], strides = [1, 1]} : vector<8x128xf32> to vector<8x32xf32>
    %187 = vector.extract_strided_slice %184 {offsets = [0, 64], sizes = [8, 32], strides = [1, 1]} : vector<8x128xf32> to vector<8x32xf32>
    %188 = vector.extract_strided_slice %183 {offsets = [0, 96], sizes = [8, 32], strides = [1, 1]} : vector<8x128xf32> to vector<8x32xf32>
    %189 = arith.mulf %186, %168 : vector<8x32xf32>
    %190 = arith.mulf %185, %187 : vector<8x32xf32>
    %191 = arith.addf %189, %190 : vector<8x32xf32>
    %192 = math.tanh %191 : vector<8x32xf32>
    %193 = arith.mulf %188, %192 : vector<8x32xf32>
    %194 = arith.index_cast %174 : i32 to index
    %c0_53 = arith.constant 0 : index
    %195 = vector.load %arg14[%194, %c0_53] : memref<64x32xf32, #tpu.memory_space<vmem>>, vector<8x32xf32>
    tpu.vector_store %arg14[%194, %c0_53], %193 {strides = array<i32>} : memref<64x32xf32, #tpu.memory_space<vmem>>, vector<8x32xf32>,
    %c8_i32_54 = arith.constant 8 : i32
    %c0_55 = arith.constant 0 : index
    %c0_56 = arith.constant 0 : index
    %c0_57 = arith.constant 0 : index
    %196 = vector.load %arg11[%c0_55, %c0_56, %c0_57] : memref<2x8x32xf32, #tpu.memory_space<vmem>>, vector<1x8x32xf32>
    %197 = vector.shape_cast %196 : vector<1x8x32xf32> to vector<8x32xf32>
    %198 = vector.shape_cast %193 : vector<8x32xf32> to vector<1x8x32xf32>
    tpu.vector_store %arg11[%c0_55, %c0_56, %c0_57], %198 {strides = array<i32>} : memref<2x8x32xf32, #tpu.memory_space<vmem>>, vector<1x8x32xf32>,
    %c0_58 = arith.constant 0 : index
    %c0_59 = arith.constant 0 : index
    %c0_60 = arith.constant 0 : index
    %199 = vector.load %arg12[%c0_58, %c0_59, %c0_60] : memref<2x8x32xf32, #tpu.memory_space<vmem>>, vector<1x8x32xf32>
    %200 = vector.shape_cast %199 : vector<1x8x32xf32> to vector<8x32xf32>
    %201 = vector.shape_cast %191 : vector<8x32xf32> to vector<1x8x32xf32>
    tpu.vector_store %arg12[%c0_58, %c0_59, %c0_60], %201 {strides = array<i32>} : memref<2x8x32xf32, #tpu.memory_space<vmem>>, vector<1x8x32xf32>,
    %c0_61 = arith.constant 0 : index
    %c0_62 = arith.constant 0 : index
    %202 = vector.load %arg7[%c0_61, %c0_62] : memref<32x128xf32, #tpu.memory_space<vmem>>, vector<32x128xf32>
    %c0_63 = arith.constant 0 : index
    %c0_64 = arith.constant 0 : index
    %203 = vector.load %arg8[%c0_63, %c0_64] : memref<32x128xf32, #tpu.memory_space<vmem>>, vector<32x128xf32>
    %c0_65 = arith.constant 0 : index
    %c0_66 = arith.constant 0 : index
    %204 = vector.load %arg9[%c0_65, %c0_66] : memref<1x128xf32, #tpu.memory_space<vmem>>, vector<1x128xf32>
    %c0_67 = arith.constant 0 : index
    %c0_68 = arith.constant 0 : index
    %205 = vector.load %arg14[%c0_67, %c0_68] : memref<64x32xf32, #tpu.memory_space<vmem>>, vector<64x32xf32>
    %cst_69 = arith.constant dense<0.000000e+00> : vector<64x128xf32>
    %206 = tpu.matmul %205, %202, %cst_69 {dimension_numbers = #tpu.dot_dimension_numbers<[1], [0], [0], [1], [0, 0, 1, 1], [], []>} : vector<64x32xf32>, vector<32x128xf32>, vector<64x128xf32> -> vector<64x128xf32>
    %207 = vector.broadcast %204 : vector<1x128xf32> to vector<64x128xf32>
    %208 = arith.addf %206, %207 : vector<64x128xf32>
    %c0_70 = arith.constant 0 : index
    %c0_71 = arith.constant 0 : index
    %209 = vector.load %arg13[%c0_70, %c0_71] : memref<64x128xf32, #tpu.memory_space<vmem>>, vector<64x128xf32>
    tpu.vector_store %arg13[%c0_70, %c0_71], %208 {strides = array<i32>} : memref<64x128xf32, #tpu.memory_space<vmem>>, vector<64x128xf32>,
    %c1 = arith.constant 1 : index
    %c0_72 = arith.constant 0 : index
    %c0_73 = arith.constant 0 : index
    %210 = vector.load %arg2[%c1, %c0_72, %c0_73] : memref<2x8x32xf32, #tpu.memory_space<vmem>>, vector<1x8x32xf32>
    %211 = vector.shape_cast %210 : vector<1x8x32xf32> to vector<8x32xf32>
    %c1_74 = arith.constant 1 : index
    %c0_75 = arith.constant 0 : index
    %c0_76 = arith.constant 0 : index
    %212 = vector.load %arg3[%c1_74, %c0_75, %c0_76] : memref<2x8x32xf32, #tpu.memory_space<vmem>>, vector<1x8x32xf32>
    %213 = vector.shape_cast %212 : vector<1x8x32xf32> to vector<8x32xf32>
    %c0_i32_77 = arith.constant 0 : i32
    %c8_i32_78 = arith.constant 8 : i32
    %214 = arith.muli %c0_i32_77, %c8_i32_78 : i32
    %215 = tpu.assume_multiple %214, 8 : i32
    %216 = arith.index_cast %215 : i32 to index
    %c0_79 = arith.constant 0 : index
    %217 = vector.load %arg13[%216, %c0_79] : memref<64x128xf32, #tpu.memory_space<vmem>>, vector<8x128xf32>
    %cst_80 = arith.constant dense<0.000000e+00> : vector<8x128xf32>
    %218 = tpu.matmul %211, %203, %cst_80 {dimension_numbers = #tpu.dot_dimension_numbers<[1], [0], [0], [1], [0, 0, 1, 1], [], []>} : vector<8x32xf32>, vector<32x128xf32>, vector<8x128xf32> -> vector<8x128xf32>
    %219 = arith.addf %217, %218 : vector<8x128xf32>
    %220 = arith.negf %219 : vector<8x128xf32>
    %221 = math.exp %220 : vector<8x128xf32>
    %cst_81 = arith.constant 1.000000e+00 : f32
    %222 = vector.broadcast %cst_81 : f32 to vector<8x128xf32>
    %223 = arith.addf %222, %221 : vector<8x128xf32>
    %224 = arith.divf %222, %223 : vector<8x128xf32>
    %225 = math.tanh %219 : vector<8x128xf32>
    %226 = vector.extract_strided_slice %224 {offsets = [0, 0], sizes = [8, 32], strides = [1, 1]} : vector<8x128xf32> to vector<8x32xf32>
    %227 = vector.extract_strided_slice %224 {offsets = [0, 32], sizes = [8, 32], strides = [1, 1]} : vector<8x128xf32> to vector<8x32xf32>
    %228 = vector.extract_strided_slice %225 {offsets = [0, 64], sizes = [8, 32], strides = [1, 1]} : vector<8x128xf32> to vector<8x32xf32>
    %229 = vector.extract_strided_slice %224 {offsets = [0, 96], sizes = [8, 32], strides = [1, 1]} : vector<8x128xf32> to vector<8x32xf32>
    %230 = arith.mulf %227, %213 : vector<8x32xf32>
    %231 = arith.mulf %226, %228 : vector<8x32xf32>
    %232 = arith.addf %230, %231 : vector<8x32xf32>
    %233 = math.tanh %232 : vector<8x32xf32>
    %234 = arith.mulf %229, %233 : vector<8x32xf32>
    %235 = arith.index_cast %c0_i32_77 : i32 to index
    %c0_82 = arith.constant 0 : index
    %c0_83 = arith.constant 0 : index
    %236 = vector.load %arg10[%235, %c0_82, %c0_83] : memref<8x8x32xf32, #tpu.memory_space<vmem>>, vector<1x8x32xf32>
    %237 = vector.shape_cast %236 : vector<1x8x32xf32> to vector<8x32xf32>
    %238 = vector.shape_cast %234 : vector<8x32xf32> to vector<1x8x32xf32>
    tpu.vector_store %arg10[%235, %c0_82, %c0_83], %238 {strides = array<i32>} : memref<8x8x32xf32, #tpu.memory_space<vmem>>, vector<1x8x32xf32>,
    %c1_i32_84 = arith.constant 1 : i32
    %c8_i32_85 = arith.constant 8 : i32
    %239 = arith.muli %c1_i32_84, %c8_i32_85 : i32
    %240 = tpu.assume_multiple %239, 8 : i32
    %241 = arith.index_cast %240 : i32 to index
    %c0_86 = arith.constant 0 : index
    %242 = vector.load %arg13[%241, %c0_86] : memref<64x128xf32, #tpu.memory_space<vmem>>, vector<8x128xf32>
    %cst_87 = arith.constant dense<0.000000e+00> : vector<8x128xf32>
    %243 = tpu.matmul %234, %203, %cst_87 {dimension_numbers = #tpu.dot_dimension_numbers<[1], [0], [0], [1], [0, 0, 1, 1], [], []>} : vector<8x32xf32>, vector<32x128xf32>, vector<8x128xf32> -> vector<8x128xf32>
    %244 = arith.addf %242, %243 : vector<8x128xf32>
    %245 = arith.negf %244 : vector<8x128xf32>
    %246 = math.exp %245 : vector<8x128xf32>
    %cst_88 = arith.constant 1.000000e+00 : f32
    %247 = vector.broadcast %cst_88 : f32 to vector<8x128xf32>
    %248 = arith.addf %247, %246 : vector<8x128xf32>
    %249 = arith.divf %247, %248 : vector<8x128xf32>
    %250 = math.tanh %244 : vector<8x128xf32>
    %251 = vector.extract_strided_slice %249 {offsets = [0, 0], sizes = [8, 32], strides = [1, 1]} : vector<8x128xf32> to vector<8x32xf32>
    %252 = vector.extract_strided_slice %249 {offsets = [0, 32], sizes = [8, 32], strides = [1, 1]} : vector<8x128xf32> to vector<8x32xf32>
    %253 = vector.extract_strided_slice %250 {offsets = [0, 64], sizes = [8, 32], strides = [1, 1]} : vector<8x128xf32> to vector<8x32xf32>
    %254 = vector.extract_strided_slice %249 {offsets = [0, 96], sizes = [8, 32], strides = [1, 1]} : vector<8x128xf32> to vector<8x32xf32>
    %255 = arith.mulf %252, %232 : vector<8x32xf32>
    %256 = arith.mulf %251, %253 : vector<8x32xf32>
    %257 = arith.addf %255, %256 : vector<8x32xf32>
    %258 = math.tanh %257 : vector<8x32xf32>
    %259 = arith.mulf %254, %258 : vector<8x32xf32>
    %260 = arith.index_cast %c1_i32_84 : i32 to index
    %c0_89 = arith.constant 0 : index
    %c0_90 = arith.constant 0 : index
    %261 = vector.load %arg10[%260, %c0_89, %c0_90] : memref<8x8x32xf32, #tpu.memory_space<vmem>>, vector<1x8x32xf32>
    %262 = vector.shape_cast %261 : vector<1x8x32xf32> to vector<8x32xf32>
    %263 = vector.shape_cast %259 : vector<8x32xf32> to vector<1x8x32xf32>
    tpu.vector_store %arg10[%260, %c0_89, %c0_90], %263 {strides = array<i32>} : memref<8x8x32xf32, #tpu.memory_space<vmem>>, vector<1x8x32xf32>,
    %c2_i32_91 = arith.constant 2 : i32
    %c8_i32_92 = arith.constant 8 : i32
    %264 = arith.muli %c2_i32_91, %c8_i32_92 : i32
    %265 = tpu.assume_multiple %264, 8 : i32
    %266 = arith.index_cast %265 : i32 to index
    %c0_93 = arith.constant 0 : index
    %267 = vector.load %arg13[%266, %c0_93] : memref<64x128xf32, #tpu.memory_space<vmem>>, vector<8x128xf32>
    %cst_94 = arith.constant dense<0.000000e+00> : vector<8x128xf32>
    %268 = tpu.matmul %259, %203, %cst_94 {dimension_numbers = #tpu.dot_dimension_numbers<[1], [0], [0], [1], [0, 0, 1, 1], [], []>} : vector<8x32xf32>, vector<32x128xf32>, vector<8x128xf32> -> vector<8x128xf32>
    %269 = arith.addf %267, %268 : vector<8x128xf32>
    %270 = arith.negf %269 : vector<8x128xf32>
    %271 = math.exp %270 : vector<8x128xf32>
    %cst_95 = arith.constant 1.000000e+00 : f32
    %272 = vector.broadcast %cst_95 : f32 to vector<8x128xf32>
    %273 = arith.addf %272, %271 : vector<8x128xf32>
    %274 = arith.divf %272, %273 : vector<8x128xf32>
    %275 = math.tanh %269 : vector<8x128xf32>
    %276 = vector.extract_strided_slice %274 {offsets = [0, 0], sizes = [8, 32], strides = [1, 1]} : vector<8x128xf32> to vector<8x32xf32>
    %277 = vector.extract_strided_slice %274 {offsets = [0, 32], sizes = [8, 32], strides = [1, 1]} : vector<8x128xf32> to vector<8x32xf32>
    %278 = vector.extract_strided_slice %275 {offsets = [0, 64], sizes = [8, 32], strides = [1, 1]} : vector<8x128xf32> to vector<8x32xf32>
    %279 = vector.extract_strided_slice %274 {offsets = [0, 96], sizes = [8, 32], strides = [1, 1]} : vector<8x128xf32> to vector<8x32xf32>
    %280 = arith.mulf %277, %257 : vector<8x32xf32>
    %281 = arith.mulf %276, %278 : vector<8x32xf32>
    %282 = arith.addf %280, %281 : vector<8x32xf32>
    %283 = math.tanh %282 : vector<8x32xf32>
    %284 = arith.mulf %279, %283 : vector<8x32xf32>
    %285 = arith.index_cast %c2_i32_91 : i32 to index
    %c0_96 = arith.constant 0 : index
    %c0_97 = arith.constant 0 : index
    %286 = vector.load %arg10[%285, %c0_96, %c0_97] : memref<8x8x32xf32, #tpu.memory_space<vmem>>, vector<1x8x32xf32>
    %287 = vector.shape_cast %286 : vector<1x8x32xf32> to vector<8x32xf32>
    %288 = vector.shape_cast %284 : vector<8x32xf32> to vector<1x8x32xf32>
    tpu.vector_store %arg10[%285, %c0_96, %c0_97], %288 {strides = array<i32>} : memref<8x8x32xf32, #tpu.memory_space<vmem>>, vector<1x8x32xf32>,
    %c3_i32_98 = arith.constant 3 : i32
    %c8_i32_99 = arith.constant 8 : i32
    %289 = arith.muli %c3_i32_98, %c8_i32_99 : i32
    %290 = tpu.assume_multiple %289, 8 : i32
    %291 = arith.index_cast %290 : i32 to index
    %c0_100 = arith.constant 0 : index
    %292 = vector.load %arg13[%291, %c0_100] : memref<64x128xf32, #tpu.memory_space<vmem>>, vector<8x128xf32>
    %cst_101 = arith.constant dense<0.000000e+00> : vector<8x128xf32>
    %293 = tpu.matmul %284, %203, %cst_101 {dimension_numbers = #tpu.dot_dimension_numbers<[1], [0], [0], [1], [0, 0, 1, 1], [], []>} : vector<8x32xf32>, vector<32x128xf32>, vector<8x128xf32> -> vector<8x128xf32>
    %294 = arith.addf %292, %293 : vector<8x128xf32>
    %295 = arith.negf %294 : vector<8x128xf32>
    %296 = math.exp %295 : vector<8x128xf32>
    %cst_102 = arith.constant 1.000000e+00 : f32
    %297 = vector.broadcast %cst_102 : f32 to vector<8x128xf32>
    %298 = arith.addf %297, %296 : vector<8x128xf32>
    %299 = arith.divf %297, %298 : vector<8x128xf32>
    %300 = math.tanh %294 : vector<8x128xf32>
    %301 = vector.extract_strided_slice %299 {offsets = [0, 0], sizes = [8, 32], strides = [1, 1]} : vector<8x128xf32> to vector<8x32xf32>
    %302 = vector.extract_strided_slice %299 {offsets = [0, 32], sizes = [8, 32], strides = [1, 1]} : vector<8x128xf32> to vector<8x32xf32>
    %303 = vector.extract_strided_slice %300 {offsets = [0, 64], sizes = [8, 32], strides = [1, 1]} : vector<8x128xf32> to vector<8x32xf32>
    %304 = vector.extract_strided_slice %299 {offsets = [0, 96], sizes = [8, 32], strides = [1, 1]} : vector<8x128xf32> to vector<8x32xf32>
    %305 = arith.mulf %302, %282 : vector<8x32xf32>
    %306 = arith.mulf %301, %303 : vector<8x32xf32>
    %307 = arith.addf %305, %306 : vector<8x32xf32>
    %308 = math.tanh %307 : vector<8x32xf32>
    %309 = arith.mulf %304, %308 : vector<8x32xf32>
    %310 = arith.index_cast %c3_i32_98 : i32 to index
    %c0_103 = arith.constant 0 : index
    %c0_104 = arith.constant 0 : index
    %311 = vector.load %arg10[%310, %c0_103, %c0_104] : memref<8x8x32xf32, #tpu.memory_space<vmem>>, vector<1x8x32xf32>
    %312 = vector.shape_cast %311 : vector<1x8x32xf32> to vector<8x32xf32>
    %313 = vector.shape_cast %309 : vector<8x32xf32> to vector<1x8x32xf32>
    tpu.vector_store %arg10[%310, %c0_103, %c0_104], %313 {strides = array<i32>} : memref<8x8x32xf32, #tpu.memory_space<vmem>>, vector<1x8x32xf32>,
    %c4_i32_105 = arith.constant 4 : i32
    %c8_i32_106 = arith.constant 8 : i32
    %314 = arith.muli %c4_i32_105, %c8_i32_106 : i32
    %315 = tpu.assume_multiple %314, 8 : i32
    %316 = arith.index_cast %315 : i32 to index
    %c0_107 = arith.constant 0 : index
    %317 = vector.load %arg13[%316, %c0_107] : memref<64x128xf32, #tpu.memory_space<vmem>>, vector<8x128xf32>
    %cst_108 = arith.constant dense<0.000000e+00> : vector<8x128xf32>
    %318 = tpu.matmul %309, %203, %cst_108 {dimension_numbers = #tpu.dot_dimension_numbers<[1], [0], [0], [1], [0, 0, 1, 1], [], []>} : vector<8x32xf32>, vector<32x128xf32>, vector<8x128xf32> -> vector<8x128xf32>
    %319 = arith.addf %317, %318 : vector<8x128xf32>
    %320 = arith.negf %319 : vector<8x128xf32>
    %321 = math.exp %320 : vector<8x128xf32>
    %cst_109 = arith.constant 1.000000e+00 : f32
    %322 = vector.broadcast %cst_109 : f32 to vector<8x128xf32>
    %323 = arith.addf %322, %321 : vector<8x128xf32>
    %324 = arith.divf %322, %323 : vector<8x128xf32>
    %325 = math.tanh %319 : vector<8x128xf32>
    %326 = vector.extract_strided_slice %324 {offsets = [0, 0], sizes = [8, 32], strides = [1, 1]} : vector<8x128xf32> to vector<8x32xf32>
    %327 = vector.extract_strided_slice %324 {offsets = [0, 32], sizes = [8, 32], strides = [1, 1]} : vector<8x128xf32> to vector<8x32xf32>
    %328 = vector.extract_strided_slice %325 {offsets = [0, 64], sizes = [8, 32], strides = [1, 1]} : vector<8x128xf32> to vector<8x32xf32>
    %329 = vector.extract_strided_slice %324 {offsets = [0, 96], sizes = [8, 32], strides = [1, 1]} : vector<8x128xf32> to vector<8x32xf32>
    %330 = arith.mulf %327, %307 : vector<8x32xf32>
    %331 = arith.mulf %326, %328 : vector<8x32xf32>
    %332 = arith.addf %330, %331 : vector<8x32xf32>
    %333 = math.tanh %332 : vector<8x32xf32>
    %334 = arith.mulf %329, %333 : vector<8x32xf32>
    %335 = arith.index_cast %c4_i32_105 : i32 to index
    %c0_110 = arith.constant 0 : index
    %c0_111 = arith.constant 0 : index
    %336 = vector.load %arg10[%335, %c0_110, %c0_111] : memref<8x8x32xf32, #tpu.memory_space<vmem>>, vector<1x8x32xf32>
    %337 = vector.shape_cast %336 : vector<1x8x32xf32> to vector<8x32xf32>
    %338 = vector.shape_cast %334 : vector<8x32xf32> to vector<1x8x32xf32>
    tpu.vector_store %arg10[%335, %c0_110, %c0_111], %338 {strides = array<i32>} : memref<8x8x32xf32, #tpu.memory_space<vmem>>, vector<1x8x32xf32>,
    %c5_i32_112 = arith.constant 5 : i32
    %c8_i32_113 = arith.constant 8 : i32
    %339 = arith.muli %c5_i32_112, %c8_i32_113 : i32
    %340 = tpu.assume_multiple %339, 8 : i32
    %341 = arith.index_cast %340 : i32 to index
    %c0_114 = arith.constant 0 : index
    %342 = vector.load %arg13[%341, %c0_114] : memref<64x128xf32, #tpu.memory_space<vmem>>, vector<8x128xf32>
    %cst_115 = arith.constant dense<0.000000e+00> : vector<8x128xf32>
    %343 = tpu.matmul %334, %203, %cst_115 {dimension_numbers = #tpu.dot_dimension_numbers<[1], [0], [0], [1], [0, 0, 1, 1], [], []>} : vector<8x32xf32>, vector<32x128xf32>, vector<8x128xf32> -> vector<8x128xf32>
    %344 = arith.addf %342, %343 : vector<8x128xf32>
    %345 = arith.negf %344 : vector<8x128xf32>
    %346 = math.exp %345 : vector<8x128xf32>
    %cst_116 = arith.constant 1.000000e+00 : f32
    %347 = vector.broadcast %cst_116 : f32 to vector<8x128xf32>
    %348 = arith.addf %347, %346 : vector<8x128xf32>
    %349 = arith.divf %347, %348 : vector<8x128xf32>
    %350 = math.tanh %344 : vector<8x128xf32>
    %351 = vector.extract_strided_slice %349 {offsets = [0, 0], sizes = [8, 32], strides = [1, 1]} : vector<8x128xf32> to vector<8x32xf32>
    %352 = vector.extract_strided_slice %349 {offsets = [0, 32], sizes = [8, 32], strides = [1, 1]} : vector<8x128xf32> to vector<8x32xf32>
    %353 = vector.extract_strided_slice %350 {offsets = [0, 64], sizes = [8, 32], strides = [1, 1]} : vector<8x128xf32> to vector<8x32xf32>
    %354 = vector.extract_strided_slice %349 {offsets = [0, 96], sizes = [8, 32], strides = [1, 1]} : vector<8x128xf32> to vector<8x32xf32>
    %355 = arith.mulf %352, %332 : vector<8x32xf32>
    %356 = arith.mulf %351, %353 : vector<8x32xf32>
    %357 = arith.addf %355, %356 : vector<8x32xf32>
    %358 = math.tanh %357 : vector<8x32xf32>
    %359 = arith.mulf %354, %358 : vector<8x32xf32>
    %360 = arith.index_cast %c5_i32_112 : i32 to index
    %c0_117 = arith.constant 0 : index
    %c0_118 = arith.constant 0 : index
    %361 = vector.load %arg10[%360, %c0_117, %c0_118] : memref<8x8x32xf32, #tpu.memory_space<vmem>>, vector<1x8x32xf32>
    %362 = vector.shape_cast %361 : vector<1x8x32xf32> to vector<8x32xf32>
    %363 = vector.shape_cast %359 : vector<8x32xf32> to vector<1x8x32xf32>
    tpu.vector_store %arg10[%360, %c0_117, %c0_118], %363 {strides = array<i32>} : memref<8x8x32xf32, #tpu.memory_space<vmem>>, vector<1x8x32xf32>,
    %c6_i32_119 = arith.constant 6 : i32
    %c8_i32_120 = arith.constant 8 : i32
    %364 = arith.muli %c6_i32_119, %c8_i32_120 : i32
    %365 = tpu.assume_multiple %364, 8 : i32
    %366 = arith.index_cast %365 : i32 to index
    %c0_121 = arith.constant 0 : index
    %367 = vector.load %arg13[%366, %c0_121] : memref<64x128xf32, #tpu.memory_space<vmem>>, vector<8x128xf32>
    %cst_122 = arith.constant dense<0.000000e+00> : vector<8x128xf32>
    %368 = tpu.matmul %359, %203, %cst_122 {dimension_numbers = #tpu.dot_dimension_numbers<[1], [0], [0], [1], [0, 0, 1, 1], [], []>} : vector<8x32xf32>, vector<32x128xf32>, vector<8x128xf32> -> vector<8x128xf32>
    %369 = arith.addf %367, %368 : vector<8x128xf32>
    %370 = arith.negf %369 : vector<8x128xf32>
    %371 = math.exp %370 : vector<8x128xf32>
    %cst_123 = arith.constant 1.000000e+00 : f32
    %372 = vector.broadcast %cst_123 : f32 to vector<8x128xf32>
    %373 = arith.addf %372, %371 : vector<8x128xf32>
    %374 = arith.divf %372, %373 : vector<8x128xf32>
    %375 = math.tanh %369 : vector<8x128xf32>
    %376 = vector.extract_strided_slice %374 {offsets = [0, 0], sizes = [8, 32], strides = [1, 1]} : vector<8x128xf32> to vector<8x32xf32>
    %377 = vector.extract_strided_slice %374 {offsets = [0, 32], sizes = [8, 32], strides = [1, 1]} : vector<8x128xf32> to vector<8x32xf32>
    %378 = vector.extract_strided_slice %375 {offsets = [0, 64], sizes = [8, 32], strides = [1, 1]} : vector<8x128xf32> to vector<8x32xf32>
    %379 = vector.extract_strided_slice %374 {offsets = [0, 96], sizes = [8, 32], strides = [1, 1]} : vector<8x128xf32> to vector<8x32xf32>
    %380 = arith.mulf %377, %357 : vector<8x32xf32>
    %381 = arith.mulf %376, %378 : vector<8x32xf32>
    %382 = arith.addf %380, %381 : vector<8x32xf32>
    %383 = math.tanh %382 : vector<8x32xf32>
    %384 = arith.mulf %379, %383 : vector<8x32xf32>
    %385 = arith.index_cast %c6_i32_119 : i32 to index
    %c0_124 = arith.constant 0 : index
    %c0_125 = arith.constant 0 : index
    %386 = vector.load %arg10[%385, %c0_124, %c0_125] : memref<8x8x32xf32, #tpu.memory_space<vmem>>, vector<1x8x32xf32>
    %387 = vector.shape_cast %386 : vector<1x8x32xf32> to vector<8x32xf32>
    %388 = vector.shape_cast %384 : vector<8x32xf32> to vector<1x8x32xf32>
    tpu.vector_store %arg10[%385, %c0_124, %c0_125], %388 {strides = array<i32>} : memref<8x8x32xf32, #tpu.memory_space<vmem>>, vector<1x8x32xf32>,
    %c7_i32_126 = arith.constant 7 : i32
    %c8_i32_127 = arith.constant 8 : i32
    %389 = arith.muli %c7_i32_126, %c8_i32_127 : i32
    %390 = tpu.assume_multiple %389, 8 : i32
    %391 = arith.index_cast %390 : i32 to index
    %c0_128 = arith.constant 0 : index
    %392 = vector.load %arg13[%391, %c0_128] : memref<64x128xf32, #tpu.memory_space<vmem>>, vector<8x128xf32>
    %cst_129 = arith.constant dense<0.000000e+00> : vector<8x128xf32>
    %393 = tpu.matmul %384, %203, %cst_129 {dimension_numbers = #tpu.dot_dimension_numbers<[1], [0], [0], [1], [0, 0, 1, 1], [], []>} : vector<8x32xf32>, vector<32x128xf32>, vector<8x128xf32> -> vector<8x128xf32>
    %394 = arith.addf %392, %393 : vector<8x128xf32>
    %395 = arith.negf %394 : vector<8x128xf32>
    %396 = math.exp %395 : vector<8x128xf32>
    %cst_130 = arith.constant 1.000000e+00 : f32
    %397 = vector.broadcast %cst_130 : f32 to vector<8x128xf32>
    %398 = arith.addf %397, %396 : vector<8x128xf32>
    %399 = arith.divf %397, %398 : vector<8x128xf32>
    %400 = math.tanh %394 : vector<8x128xf32>
    %401 = vector.extract_strided_slice %399 {offsets = [0, 0], sizes = [8, 32], strides = [1, 1]} : vector<8x128xf32> to vector<8x32xf32>
    %402 = vector.extract_strided_slice %399 {offsets = [0, 32], sizes = [8, 32], strides = [1, 1]} : vector<8x128xf32> to vector<8x32xf32>
    %403 = vector.extract_strided_slice %400 {offsets = [0, 64], sizes = [8, 32], strides = [1, 1]} : vector<8x128xf32> to vector<8x32xf32>
    %404 = vector.extract_strided_slice %399 {offsets = [0, 96], sizes = [8, 32], strides = [1, 1]} : vector<8x128xf32> to vector<8x32xf32>
    %405 = arith.mulf %402, %382 : vector<8x32xf32>
    %406 = arith.mulf %401, %403 : vector<8x32xf32>
    %407 = arith.addf %405, %406 : vector<8x32xf32>
    %408 = math.tanh %407 : vector<8x32xf32>
    %409 = arith.mulf %404, %408 : vector<8x32xf32>
    %410 = arith.index_cast %c7_i32_126 : i32 to index
    %c0_131 = arith.constant 0 : index
    %c0_132 = arith.constant 0 : index
    %411 = vector.load %arg10[%410, %c0_131, %c0_132] : memref<8x8x32xf32, #tpu.memory_space<vmem>>, vector<1x8x32xf32>
    %412 = vector.shape_cast %411 : vector<1x8x32xf32> to vector<8x32xf32>
    %413 = vector.shape_cast %409 : vector<8x32xf32> to vector<1x8x32xf32>
    tpu.vector_store %arg10[%410, %c0_131, %c0_132], %413 {strides = array<i32>} : memref<8x8x32xf32, #tpu.memory_space<vmem>>, vector<1x8x32xf32>,
    %c8_i32_133 = arith.constant 8 : i32
    %c1_134 = arith.constant 1 : index
    %c0_135 = arith.constant 0 : index
    %c0_136 = arith.constant 0 : index
    %414 = vector.load %arg11[%c1_134, %c0_135, %c0_136] : memref<2x8x32xf32, #tpu.memory_space<vmem>>, vector<1x8x32xf32>
    %415 = vector.shape_cast %414 : vector<1x8x32xf32> to vector<8x32xf32>
    %416 = vector.shape_cast %409 : vector<8x32xf32> to vector<1x8x32xf32>
    tpu.vector_store %arg11[%c1_134, %c0_135, %c0_136], %416 {strides = array<i32>} : memref<2x8x32xf32, #tpu.memory_space<vmem>>, vector<1x8x32xf32>,
    %c1_137 = arith.constant 1 : index
    %c0_138 = arith.constant 0 : index
    %c0_139 = arith.constant 0 : index
    %417 = vector.load %arg12[%c1_137, %c0_138, %c0_139] : memref<2x8x32xf32, #tpu.memory_space<vmem>>, vector<1x8x32xf32>
    %418 = vector.shape_cast %417 : vector<1x8x32xf32> to vector<8x32xf32>
    %419 = vector.shape_cast %407 : vector<8x32xf32> to vector<1x8x32xf32>
    tpu.vector_store %arg12[%c1_137, %c0_138, %c0_139], %419 {strides = array<i32>} : memref<2x8x32xf32, #tpu.memory_space<vmem>>, vector<1x8x32xf32>,
    return
  }
  func.func @transform_0(%arg0: i32) -> (i32, i32) {
    %c0_i32 = arith.constant 0 : i32
    %c0_i32_0 = arith.constant 0 : i32
    %c0_i32_1 = arith.constant 0 : i32
    return %c0_i32, %c0_i32_0 : i32, i32
  }
  func.func @transform_1(%arg0: i32) -> (i32, i32, i32) {
    %c0_i32 = arith.constant 0 : i32
    %c0_i32_0 = arith.constant 0 : i32
    %c0_i32_1 = arith.constant 0 : i32
    %c0_i32_2 = arith.constant 0 : i32
    return %c0_i32, %c0_i32_0, %c0_i32_1 : i32, i32, i32
  }
  func.func @transform_2(%arg0: i32) -> (i32, i32, i32) {
    %c0_i32 = arith.constant 0 : i32
    %c0_i32_0 = arith.constant 0 : i32
    %c0_i32_1 = arith.constant 0 : i32
    %c0_i32_2 = arith.constant 0 : i32
    return %c0_i32, %c0_i32_0, %c0_i32_1 : i32, i32, i32
  }
  func.func @transform_3(%arg0: i32) -> (i32, i32) {
    %c0_i32 = arith.constant 0 : i32
    %c0_i32_0 = arith.constant 0 : i32
    %c0_i32_1 = arith.constant 0 : i32
    return %c0_i32, %c0_i32_0 : i32, i32
  }
  func.func @transform_4(%arg0: i32) -> (i32, i32) {
    %c0_i32 = arith.constant 0 : i32
    %c0_i32_0 = arith.constant 0 : i32
    %c0_i32_1 = arith.constant 0 : i32
    return %c0_i32, %c0_i32_0 : i32, i32
  }
  func.func @transform_5(%arg0: i32) -> (i32, i32) {
    %c0_i32 = arith.constant 0 : i32
    %c0_i32_0 = arith.constant 0 : i32
    %c0_i32_1 = arith.constant 0 : i32
    return %c0_i32, %c0_i32_0 : i32, i32
  }
  func.func @transform_6(%arg0: i32) -> (i32, i32) {
    %c0_i32 = arith.constant 0 : i32
    %c0_i32_0 = arith.constant 0 : i32
    %c0_i32_1 = arith.constant 0 : i32
    return %c0_i32, %c0_i32_0 : i32, i32
  }
  func.func @transform_7(%arg0: i32) -> (i32, i32) {
    %c0_i32 = arith.constant 0 : i32
    %c0_i32_0 = arith.constant 0 : i32
    %c0_i32_1 = arith.constant 0 : i32
    return %c0_i32, %c0_i32_0 : i32, i32
  }
  func.func @transform_8(%arg0: i32) -> (i32, i32) {
    %c0_i32 = arith.constant 0 : i32
    %c0_i32_0 = arith.constant 0 : i32
    %c0_i32_1 = arith.constant 0 : i32
    return %c0_i32, %c0_i32_0 : i32, i32
  }
  func.func @transform_9(%arg0: i32) -> (i32, i32, i32) {
    %c0_i32 = arith.constant 0 : i32
    %c0_i32_0 = arith.constant 0 : i32
    %c0_i32_1 = arith.constant 0 : i32
    %c0_i32_2 = arith.constant 0 : i32
    return %c0_i32, %c0_i32_0, %c0_i32_1 : i32, i32, i32
  }
  func.func @transform_10(%arg0: i32) -> (i32, i32, i32) {
    %c0_i32 = arith.constant 0 : i32
    %c0_i32_0 = arith.constant 0 : i32
    %c0_i32_1 = arith.constant 0 : i32
    %c0_i32_2 = arith.constant 0 : i32
    return %c0_i32, %c0_i32_0, %c0_i32_1 : i32, i32, i32
  }
  func.func @transform_11(%arg0: i32) -> (i32, i32, i32) {
    %c0_i32 = arith.constant 0 : i32
    %c0_i32_0 = arith.constant 0 : i32
    %c0_i32_1 = arith.constant 0 : i32
    %c0_i32_2 = arith.constant 0 : i32
    return %c0_i32, %c0_i32_0, %c0_i32_1 : i32, i32, i32
  }
}

</mosaic_0001>

<bundles_post_ra>
// kernel: tpu_custom_call.1
= control target key start
LH: loop header
LB: loop body
LE: loop exit
PB: predicated region body
PF: predicated region fallthrough
CT: control target
= control target key end

     0   :  { %17 = vsyncpa [#allocation5], 0  ;;  %s3445_s0 = inlined_call_operand.vmem [shape: f32[64,32], index: 0, kind: input, shape index: {}]   ;;  %s3446_s1 = inlined_call_operand.hbm [shape: f32[2,8,32], index: 1, kind: input, shape index: {}]   ;;  %s3447_s2 = inlined_call_operand.hbm [shape: f32[2,8,32], index: 2, kind: input, shape index: {}]   ;;  %s3448_s3 = inlined_call_operand.vmem [shape: f32[32,128], index: 3, kind: input, shape index: {}]   ;;  %s3449_s4 = inlined_call_operand.vmem [shape: f32[32,128], index: 4, kind: input, shape index: {}]   ;;  %s3450_s5 = inlined_call_operand.vmem [shape: f32[1,128], index: 5, kind: input, shape index: {}]   ;;  %s3451_s6 = inlined_call_operand.vmem [shape: f32[32,128], index: 6, kind: input, shape index: {}]   ;;  %s3452_s7 = inlined_call_operand.hbm [shape: f32[32,128], index: 7, kind: input, shape index: {}]   ;;  %s3453_s8 = inlined_call_operand.vmem [shape: f32[1,128], index: 8, kind: input, shape index: {}]   ;;  %s3454_s9 = inlined_call_operand.hbm [shape: f32[8,8,32], index: 9, kind: output, shape index: {0}]   ;;  %s3455_s10 = inlined_call_operand.hbm [shape: f32[2,8,32], index: 10, kind: output, shape index: {1}]   ;;  %s3456_s11 = inlined_call_operand.hbm [shape: f32[2,8,32], index: 11, kind: output, shape index: {2}]  }
   0x1   :  { %18 = vsyncpa [#allocation8], 0 }
   0x2   :  { %19 = vsyncpa [#allocation6], 0 }
   0x3   :  { %20 = vsyncpa [#allocation12], 0  ;;  %s2911_s17 = smov [#allocation7]   ;;  %s2912_s19 = smov [#allocation4]  }
   0x4   :  { %s40_s18 = sshll.u32 %s2911_s17, 4  ;;  %s28_s20 = sshll.u32 %s2912_s19, 4  ;;  %s41_s18 = int_to_ptr.vmem [resolvable:$true] %s40_s18  ;;  %s2985_s20 = int_to_ptr.vmem [resolvable:$true] %s28_s20 }
   0x5   :  { %s2771_s23 = scalar_lea.hbm %s3447_s2, 256 }
   0x6   :  { %p2772_p0 = scmp.ne.s32.totalorder %s3447_s2, %s2771_s23  ;;  %p2775_p1 = scmp.lt.u32.totalorder %s2771_s23, %s3447_s2 }
   0x8   :  { %p2777_p2 = pnand %p2775_p1, %p2772_p0 }
   0xa   :  { %2780 = shalt.err (!%p2777_p2)
}
   0xb   :  { %s2781_s28 = scalar_lea.vmem %s41_s18, 256  ;;  %p2786_p4 = scmp.lt.s32.totalorder %s41_s18, %s41_s18 }
   0xc   :  { %p2782_p3 = scmp.ne.s32.totalorder %s41_s18, %s2781_s28  ;;  %p2787_p5 = scmp.lt.s32.totalorder %s2781_s28, %s2781_s28 }
   0xe   :  { %p2788_p6 = por %p2787_p5, %p2786_p4 }
  0x10   :  { %p2789_p7 = pnand %p2788_p6, %p2782_p3 }
  0x12   :  { %2792 = shalt.err (!%p2789_p7)
}
  0x13   :  { %s2913_s29 = smov 128   ;;  %s2914_s30 = smov 8  }
  0x14   :  { %46 = dma.hbm_to_vmem [thread:$0]  %s3447_s2, 256, %s41_s18, [#allocation8], %s2913_s29, %s2913_s29, %s2914_s30  }
  0x15   :  { %s2793_s16 = scalar_lea.hbm %s3446_s1, 256 }
  0x16   :  { %p2794_p8 = scmp.ne.s32.totalorder %s3446_s1, %s2793_s16  ;;  %p2797_p9 = scmp.lt.u32.totalorder %s2793_s16, %s3446_s1 }
  0x18   :  { %p2799_p10 = pnand %p2797_p9, %p2794_p8 }
  0x1a   :  { %2802 = shalt.err (!%p2799_p10)
}
  0x1b   :  { %s2803_s23 = scalar_lea.vmem %s2985_s20, 256  ;;  %p2808_p12 = scmp.lt.s32.totalorder %s2985_s20, %s2985_s20 }
  0x1c   :  { %p2804_p11 = scmp.ne.s32.totalorder %s2985_s20, %s2803_s23  ;;  %p2809_p13 = scmp.lt.s32.totalorder %s2803_s23, %s2803_s23 }
  0x1e   :  { %p2810_p0 = por %p2809_p13, %p2808_p12 }
  0x20   :  { %p2811_p1 = pnand %p2810_p0, %p2804_p11 }
  0x22   :  { %2814 = shalt.err (!%p2811_p1)
}
  0x23   :  { %34 = dma.hbm_to_vmem [thread:$0]  %s3446_s1, 256, %s2985_s20, [#allocation5], %s2913_s29, %s2913_s29, %s2914_s30  }
  0x24   :  { %s2915_s24 = smov [#allocation9]   ;;  %s2815_s28 = scalar_lea.hbm %s3452_s7, 512 }
  0x25   :  { %s60_s25 = sshll.u32 %s2915_s24, 4  ;;  %p2816_p2 = scmp.ne.s32.totalorder %s3452_s7, %s2815_s28  ;;  %s61_s25 = int_to_ptr.vmem [resolvable:$true] %s60_s25 }
  0x26   :  { %p2819_p3 = scmp.lt.u32.totalorder %s2815_s28, %s3452_s7 }
  0x28   :  { %p2821_p4 = pnand %p2819_p3, %p2816_p2 }
  0x2a   :  { %2824 = shalt.err (!%p2821_p4)
}
  0x2b   :  { %s2825_s16 = scalar_lea.vmem %s61_s25, 512  ;;  %p2830_p6 = scmp.lt.s32.totalorder %s61_s25, %s61_s25 }
  0x2c   :  { %p2826_p5 = scmp.ne.s32.totalorder %s61_s25, %s2825_s16  ;;  %p2831_p7 = scmp.lt.s32.totalorder %s2825_s16, %s2825_s16 }
  0x2e   :  { %p2832_p8 = por %p2831_p7, %p2830_p6 }
  0x30   :  { %p2833_p9 = pnand %p2832_p8, %p2826_p5 }
  0x32   :  { %2836 = shalt.err (!%p2833_p9)
}
  0x33   :  { %66 = dma.hbm_to_vmem [thread:$0]  %s3452_s7, 512, %s61_s25, [#allocation8], %s2913_s29, %s2913_s29, %s2914_s30  }
  0x34   :  { %2903 = dma.done.wait [#allocation5], 256  }
  0x35   :  { %2904 = vsyncadd [#allocation5], 4294967040 }
  0x36   :  { %2905 = dma.done.wait [#allocation8], 768  }
  0x37   :  { %2906 = vsyncadd [#allocation8], 4294966528  ;;  %v2916_v0 = vmov 0.0|0.0   ;;  %vm2917_vm0 = vmmov 0   ;;  %v2918_v1 = vmov 0.0   ;;  %v78_v2 = vld [vmem:[%s3448_s3] sm:$0xff] }
  0x38   :  { %2525 = vmatprep.subr.bf16.mxu1 %v2916_v0  ;;  %2329 = vmatprep.mubr.msk.f32.mxu1 %vm2917_vm0, %v2918_v1  ;;  %v79_v3 = vld [vmem:[%s3448_s3 + $0x8] sm:$0xff]  ;;  %v82_v4 = vld [vmem:[%s3449_s4] sm:$0xff]  ;;  %vm101_vm1 = vcmask 261120   ;;  %v80_v7 = vld [vmem:[%s3448_s3 + $0x10] sm:$0xff]  ;;  %s2919_s17 = smov 64   ;;  %s2920_s19 = smov 32  }
  0x39   :  { %v2517_v5 = vpack.c.bf16 %v79_v3, %v78_v2  ;;  %v83_v6 = vld [vmem:[%s3449_s4 + $0x8] sm:$0xff]  ;;  %v81_v8 = vld [vmem:[%s3448_s3 + $0x18] sm:$0xff]  ;;  %v87_v11 = vld [vmem:[%s3445_s0] sm:$0xff]  ;;  %s2922_s20 = smov [#allocation11]   ;;  %s2923_s21 = smov [#allocation10]  }
  0x3a   :  { %v3058_v9 = vpack.c.bf16 %v83_v6, %v82_v4  ;;  %v2521_v10 = vpack.c.bf16 %v81_v8, %v80_v7  ;;  %v84_v12 = vld [vmem:[%s3449_s4 + $0x10] sm:$0xff]  ;;  %v85_v13 = vld [vmem:[%s3449_s4 + $0x18] sm:$0xff]  ;;  %2309 = vmatprep.mubr.msk.f32.mxu0 %vm101_vm1, %v87_v11  ;;  %v88_v15 = vld [vmem:[%s3445_s0 + $0x8] sm:$0xff]  ;;  %s2103_s22 = sshll.u32 %s2923_s21, 4  ;;  %s2924_s7 = smov [#allocation13]   ;;  %s3383_s22 = int_to_ptr.vmem [resolvable:$true] %s2103_s22 }
  0x3b   :  { %2518 = vmatprep.subr.bf16.mxu0 %v2517_v5  ;;  %v3071_v14 = vpack.c.bf16 %v85_v13, %v84_v12  ;;  %v239_v16 = vld [vmem:[#allocation4] sm:$0xff]  ;;  %v240_v25 = vld [vmem:[#allocation7] sm:$0xff]  ;;  %v90_v55 = vld [vmem:[%s3445_s0 + $0x18] sm:$0xff]  ;;  %s2127_s23 = sshll.u32 %s2924_s7, 4  ;;  %s3387_s23 = int_to_ptr.vmem [resolvable:$true] %s2127_s23 }
  0x3c   :  { %2520 = vmatpush3.bf16.msra.mxu0 %v2517_v5  ;;  %2527 = vmatpush3.bf16.msra.mxu1 %v3058_v9  ;;  %v3095_v17 = vld [vmem:[%s3450_s5] ss:$0 sm:$0xff]  ;;  %v89_v54 = vld [vmem:[%s3445_s0 + $0x10] sm:$0xff]  ;;  %v92_v57 = vld [vmem:[%s3445_s0 + $0x28] sm:$0xff]  ;;  %s2115_s5 = sshll.u32 %s2922_s20, 4  ;;  %s2116_s5 = int_to_ptr.vmem [resolvable:$true] %s2115_s5 }
  0x3d   :  { %2522 = vmatprep.subr.bf16.mxu0 %v2521_v10  ;;  %2528 = vmatprep.subr.bf16.mxu1 %v2916_v0  ;;  %v91_v56 = vld [vmem:[%s3445_s0 + $0x20] sm:$0xff]  ;;  %v93_v58 = vld [vmem:[%s3445_s0 + $0x30] sm:$0xff]  ;;  %v94_v59 = vld [vmem:[%s3445_s0 + $0x38] sm:$0xff]  ;;  %p2842_p11 = scmp.lt.s32.totalorder %s2116_s5, %s2116_s5 }
  0x40   :  { %2524 = vmatpush3.bf16.msra.mxu0 %v2521_v10  ;;  %2530 = vmatpush3.bf16.msra.mxu1 %v3071_v14 }
  0x41   :  { %2531 = vmatprep.subr.bf16.mxu1 %v2916_v0  ;;  %2537 = vmatprep.subr.bf16.mxu0 %v2916_v0 }
  0x43   :  { %2310 = vmatmul.mubr.msk.f32.vlgmr.msra.gmra.mrb[0].mxu0 %vm101_vm1, %v88_v15  ;;  %2330 = vmatmul.mubr.msk.f32.vlgmr.msra.gmra.mrb[0].mxu1 %vm101_vm1, %v239_v16 }
  0x44   :  { %2533 = vmatpush3.bf16.msra.mxu1 %v3058_v9  ;;  %2340 = vmatprep.mubr.msk.f32.mxu1 %vm2917_vm0, %v2918_v1 }
  0x45   :  { %2534 = vmatprep.subr.bf16.mxu1 %v2916_v0  ;;  %2539 = vmatpush3.bf16.msra.mxu0 %v3058_v9 }
  0x46   :  { %2540 = vmatprep.subr.bf16.mxu0 %v2916_v0  ;;  %2312 = vmatprep.mubr.msk.f32.mxu0 %vm101_vm1, %v89_v54 }
  0x47   :  { %2313 = vmatmul.mubr.msk.f32.gmra.mrb[2].mxu0 %vm101_vm1, %v90_v55 }
  0x48   :  { %2536 = vmatpush3.bf16.msra.mxu1 %v3071_v14  ;;  %2315 = vmatprep.mubr.msk.f32.mxu0 %vm101_vm1, %v91_v56 }
  0x49   :  { %2542 = vmatpush3.bf16.msra.mxu0 %v3071_v14  ;;  %2543 = vmatprep.subr.bf16.mxu1 %v2916_v0 }
  0x4a   :  { %2549 = vmatprep.subr.bf16.mxu0 %v2916_v0 }
  0x4b   :  { %2316 = vmatmul.mubr.msk.f32.gmra.mrb[4].mxu0 %vm101_vm1, %v92_v57 }
  0x4c   :  { %2318 = vmatprep.mubr.msk.f32.mxu0 %vm101_vm1, %v93_v58 }
  0x4f   :  { %2319 = vmatmul.mubr.msk.f32.gmra.mrb[6].mxu0 %vm101_vm1, %v94_v59 }
  0x50   :  { %2351 = vmatprep.mubr.msk.f32.mxu0 %vm2917_vm0, %v2918_v1 }
 0x116   :  { %v2311_v18 = vpop.f32.mrb[0].mxu0  ;;  %v311_v19 = vpop.f32.mrb[0].mxu1 }
 0x117   :  { %v192_v20 = vpop.f32.mrb[1].mxu0  ;;  %v2331_v21 = vpop.f32.mrb[1].mxu1  ;;  %v198_v40 = vadd.f32 %v2311_v18, %v3095_v17 }
 0x118   :  { %v193_v22 = vadd.f32 %v3095_v17, %v192_v20 }
 0x11a   :  { %v315_v23 = vadd.f32 %v311_v19, %v193_v22  ;;  %v2314_v63 = vpop.f32.mrb[2].mxu0 }
 0x11b   :  { %v202_v2 = vpop.f32.mrb[3].mxu0 }
 0x11c   :  { %2643 = vtanh.f32 %v315_v23  ;;  %v2157_v26 = vmul.f32 -1.442695, %v315_v23  ;;  %v203_v8 = vadd.f32 %v3095_v17, %v202_v2 }
 0x11e   :  { %2645 = vpow2.f32 %v2157_v26  ;;  %v3142_v3 = vpop.f32.mrb[4].mxu0 }
 0x11f   :  { %v3144_v4 = vpop.f32.mrb[5].mxu0 }
 0x122   :  { %v3146_v5 = vpop.f32.mrb[6].mxu0 }
 0x123   :  { %v3148_v6 = vpop.f32.mrb[7].mxu0 }
 0x126   :  { %v2644_v24 = vpop.eup %2643 }
 0x127   :  { %329 = vrot.lane.b32.xlu0 %v2644_v24, %s2919_s17 }
 0x128   :  { %v2646_v27 = vpop.eup %2645 }
 0x129   :  { %v319_v28 = vadd.f32 1.0, %v2646_v27 }
 0x12b   :  { %324 = vrot.lane.b32.xlu0 %v240_v25, %s2920_s19  ;;  %2647 = vrcp.f32 %v319_v28 }
 0x135   :  { %v2648_v29 = vpop.eup %2647 }
 0x199   :  { %v330_v30 = vpop.permute.xlu0 %329 }
 0x19a   :  { %v332_v31 = vmul.f32 %v2648_v29, %v330_v30 }
 0x19c   :  { %334 = vrot.lane.b32.xlu1 %v332_v31, %s2920_s19 }
 0x19d   :  { %v325_v32 = vpop.permute.xlu0 %324 }
 0x19e   :  { %v327_v33 = vmul.f32 %v2648_v29, %v325_v32 }
 0x20e   :  { %v335_v34 = vpop.permute.xlu1 %334 }
 0x20f   :  { %v337_v35 = vadd.f32 %v335_v34, %v327_v33 }
 0x211   :  { %2649 = vtanh.f32 %v337_v35 }
 0x21b   :  { %v2650_v36 = vpop.eup %2649 }
 0x21c   :  { %340 = vrot.lane.b32.xlu1 %v2650_v36, %s2919_s17 }
 0x28e   :  { %v341_v37 = vpop.permute.xlu1 %340 }
 0x28f   :  { %v343_v38 = vmul.f32 %v2648_v29, %v341_v37  ;;  %v208_v29 = vadd.f32 %v2314_v63, %v3095_v17 }
 0x291   :  { %345 = vrot.lane.b32.xlu0 %v343_v38, %s2920_s19 }
 0x303   :  { %v346_v39 = vpop.permute.xlu0 %345 }
 0x304   :  { %348 = vst.msk [vmem:[#allocation3] sm:$0xff] %vm101_vm1, %v346_v39  ;;  %2341 = vmatmul.mubr.msk.f32.vlgmr.msra.gmra.mrb[2].mxu1 %vm101_vm1, %v346_v39 }
 0x305   :  { %2545 = vmatpush3.bf16.msra.mxu1 %v3058_v9  ;;  %2362 = vmatprep.mubr.msk.f32.mxu1 %vm2917_vm0, %v2918_v1 }
 0x306   :  { %2546 = vmatprep.subr.bf16.mxu1 %v2916_v0 }
 0x309   :  { %2548 = vmatpush3.bf16.msra.mxu1 %v3071_v14 }
 0x30a   :  { %2555 = vmatprep.subr.bf16.mxu1 %v2916_v0 }
 0x3d7   :  { %v419_v41 = vpop.f32.mrb[2].mxu1 }
 0x3d8   :  { %v423_v42 = vadd.f32 %v419_v41, %v198_v40  ;;  %v2342_v43 = vpop.f32.mrb[3].mxu1 }
 0x3da   :  { %2651 = vtanh.f32 %v423_v42  ;;  %v2159_v45 = vmul.f32 -1.442695, %v423_v42 }
 0x3dc   :  { %2653 = vpow2.f32 %v2159_v45 }
 0x3e4   :  { %v2652_v44 = vpop.eup %2651 }
 0x3e5   :  { %433 = vrot.lane.b32.xlu1 %v2652_v44, %s2919_s17 }
 0x3e6   :  { %v2654_v46 = vpop.eup %2653 }
 0x3e7   :  { %v427_v47 = vadd.f32 1.0, %v2654_v46 }
 0x3e9   :  { %2655 = vrcp.f32 %v427_v47  ;;  %v213_v47 = vadd.f32 %v3095_v17, %v3144_v4  ;;  %v218_v4 = vadd.f32 %v3142_v3, %v3095_v17 }
 0x3f3   :  { %v2656_v48 = vpop.eup %2655 }
 0x3f4   :  { %v431_v51 = vmul.f32 %v2656_v48, %v337_v35 }
 0x457   :  { %v434_v49 = vpop.permute.xlu1 %433 }
 0x458   :  { %v436_v50 = vmul.f32 %v2656_v48, %v434_v49 }
 0x45a   :  { %438 = vrot.lane.b32.xlu0 %v436_v50, %s2920_s19 }
 0x4cc   :  { %v439_v52 = vpop.permute.xlu0 %438 }
 0x4cd   :  { %v441_v53 = vadd.f32 %v439_v52, %v431_v51 }
 0x4cf   :  { %2657 = vtanh.f32 %v441_v53 }
 0x4d9   :  { %v2658_v60 = vpop.eup %2657 }
 0x4da   :  { %444 = vrot.lane.b32.xlu1 %v2658_v60, %s2919_s17 }
 0x54c   :  { %v445_v61 = vpop.permute.xlu1 %444 }
 0x54d   :  { %v447_v62 = vmul.f32 %v2656_v48, %v445_v61 }
 0x54f   :  { %449 = vrot.lane.b32.xlu0 %v447_v62, %s2920_s19 }
 0x5c1   :  { %v450_v7 = vpop.permute.xlu0 %449 }
 0x5c2   :  { %453 = vst.msk [vmem:[#allocation3 + $0x8] sm:$0xff] %vm101_vm1, %v450_v7  ;;  %2352 = vmatmul.mubr.msk.f32.vlgmr.msra.gmra.mrb[8].mxu0 %vm101_vm1, %v450_v7 }
 0x5c3   :  { %2551 = vmatpush3.bf16.msra.mxu0 %v3058_v9  ;;  %2373 = vmatprep.mubr.msk.f32.mxu0 %vm2917_vm0, %v2918_v1 }
 0x5c4   :  { %2552 = vmatprep.subr.bf16.mxu0 %v2916_v0 }
 0x5c7   :  { %2554 = vmatpush3.bf16.msra.mxu0 %v3071_v14 }
 0x5c8   :  { %2561 = vmatprep.subr.bf16.mxu0 %v2916_v0 }
 0x695   :  { %v524_v10 = vpop.f32.mrb[8].mxu0 }
 0x696   :  { %v528_v11 = vadd.f32 %v524_v10, %v203_v8  ;;  %v2353_v12 = vpop.f32.mrb[9].mxu0 }
 0x698   :  { %2659 = vtanh.f32 %v528_v11  ;;  %v2161_v15 = vmul.f32 -1.442695, %v528_v11 }
 0x69a   :  { %2661 = vpow2.f32 %v2161_v15 }
 0x6a2   :  { %v2660_v13 = vpop.eup %2659 }
 0x6a3   :  { %538 = vrot.lane.b32.xlu1 %v2660_v13, %s2919_s17 }
 0x6a4   :  { %v2662_v16 = vpop.eup %2661 }
 0x6a5   :  { %v532_v18 = vadd.f32 1.0, %v2662_v16 }
 0x6a7   :  { %2663 = vrcp.f32 %v532_v18 }
 0x6b1   :  { %v2664_v19 = vpop.eup %2663 }
 0x6b2   :  { %v536_v22 = vmul.f32 %v2664_v19, %v441_v53 }
 0x715   :  { %v539_v20 = vpop.permute.xlu1 %538 }
 0x716   :  { %v541_v21 = vmul.f32 %v2664_v19, %v539_v20  ;;  %v1090_v20 = vld [vmem:[%s3451_s6] sm:$0xff] }
 0x718   :  { %543 = vrot.lane.b32.xlu0 %v541_v21, %s2920_s19  ;;  %v1091_v21 = vld [vmem:[%s3451_s6 + $0x8] sm:$0xff] }
 0x78a   :  { %v544_v23 = vpop.permute.xlu0 %543 }
 0x78b   :  { %v546_v24 = vadd.f32 %v544_v23, %v536_v22  ;;  %v2573_v22 = vpack.c.bf16 %v1091_v21, %v1090_v20 }
 0x78d   :  { %2665 = vtanh.f32 %v546_v24 }
 0x797   :  { %v2666_v25 = vpop.eup %2665 }
 0x798   :  { %549 = vrot.lane.b32.xlu1 %v2666_v25, %s2919_s17 }
 0x80a   :  { %v550_v26 = vpop.permute.xlu1 %549 }
 0x80b   :  { %v552_v27 = vmul.f32 %v2664_v19, %v550_v26  ;;  %v1092_v26 = vld [vmem:[%s3451_s6 + $0x10] sm:$0xff] }
 0x80d   :  { %554 = vrot.lane.b32.xlu0 %v552_v27, %s2920_s19  ;;  %v1093_v27 = vld [vmem:[%s3451_s6 + $0x18] sm:$0xff] }
 0x87f   :  { %v555_v28 = vpop.permute.xlu0 %554 }
 0x880   :  { %558 = vst.msk [vmem:[#allocation3 + $0x10] sm:$0xff] %vm101_vm1, %v555_v28  ;;  %2363 = vmatmul.mubr.msk.f32.vlgmr.msra.gmra.mrb[4].mxu1 %vm101_vm1, %v555_v28  ;;  %v2577_v28 = vpack.c.bf16 %v1093_v27, %v1092_v26 }
 0x881   :  { %2557 = vmatpush3.bf16.msra.mxu1 %v3058_v9  ;;  %2384 = vmatprep.mubr.msk.f32.mxu1 %vm2917_vm0, %v2918_v1 }
 0x882   :  { %2558 = vmatprep.subr.bf16.mxu1 %v2916_v0 }
 0x885   :  { %2560 = vmatpush3.bf16.msra.mxu1 %v3071_v14 }
 0x886   :  { %2567 = vmatprep.subr.bf16.mxu1 %v2916_v0 }
 0x953   :  { %v629_v30 = vpop.f32.mrb[4].mxu1 }
 0x954   :  { %v633_v31 = vadd.f32 %v629_v30, %v208_v29  ;;  %v2364_v32 = vpop.f32.mrb[5].mxu1  ;;  %v1099_v30 = vld [vmem:[#allocation3] sm:$0xff] }
 0x955   :  { %v1101_v32 = vld [vmem:[#allocation3 + $0x10] sm:$0xff] }
 0x956   :  { %2667 = vtanh.f32 %v633_v31  ;;  %v2163_v34 = vmul.f32 -1.442695, %v633_v31  ;;  %v1100_v31 = vld [vmem:[#allocation3 + $0x8] sm:$0xff] }
 0x958   :  { %2669 = vpow2.f32 %v2163_v34 }
 0x960   :  { %v2668_v33 = vpop.eup %2667 }
 0x961   :  { %643 = vrot.lane.b32.xlu1 %v2668_v33, %s2919_s17 }
 0x962   :  { %v2670_v35 = vpop.eup %2669 }
 0x963   :  { %v637_v36 = vadd.f32 1.0, %v2670_v35 }
 0x965   :  { %2671 = vrcp.f32 %v637_v36  ;;  %v223_v36 = vadd.f32 %v3095_v17, %v3148_v6 }
 0x96f   :  { %v2672_v37 = vpop.eup %2671 }
 0x970   :  { %v641_v40 = vmul.f32 %v2672_v37, %v546_v24 }
 0x9d3   :  { %v644_v38 = vpop.permute.xlu1 %643 }
 0x9d4   :  { %v646_v39 = vmul.f32 %v2672_v37, %v644_v38 }
 0x9d6   :  { %648 = vrot.lane.b32.xlu0 %v646_v39, %s2920_s19 }
 0xa48   :  { %v649_v41 = vpop.permute.xlu0 %648 }
 0xa49   :  { %v651_v42 = vadd.f32 %v649_v41, %v641_v40 }
 0xa4b   :  { %2673 = vtanh.f32 %v651_v42 }
 0xa55   :  { %v2674_v43 = vpop.eup %2673 }
 0xa56   :  { %654 = vrot.lane.b32.xlu1 %v2674_v43, %s2919_s17 }
 0xac8   :  { %v655_v44 = vpop.permute.xlu1 %654 }
 0xac9   :  { %v657_v45 = vmul.f32 %v2672_v37, %v655_v44 }
 0xacb   :  { %659 = vrot.lane.b32.xlu0 %v657_v45, %s2920_s19 }
 0xb3d   :  { %v660_v46 = vpop.permute.xlu0 %659 }
 0xb3e   :  { %663 = vst.msk [vmem:[#allocation3 + $0x18] sm:$0xff] %vm101_vm1, %v660_v46  ;;  %2374 = vmatmul.mubr.msk.f32.vlgmr.msra.gmra.mrb[10].mxu0 %vm101_vm1, %v660_v46 }
 0xb3f   :  { %2563 = vmatpush3.bf16.msra.mxu0 %v3058_v9  ;;  %2395 = vmatprep.mubr.msk.f32.mxu0 %vm2917_vm0, %v2918_v1 }
 0xb40   :  { %2564 = vmatprep.subr.bf16.mxu0 %v2916_v0 }
 0xb43   :  { %2566 = vmatpush3.bf16.msra.mxu0 %v3071_v14 }
 0xb44   :  { %2574 = vmatprep.subr.bf16.mxu0 %v2573_v22 }
 0xb45   :  { %v1102_v33 = vld [vmem:[#allocation3 + $0x18] sm:$0xff] }
 0xc11   :  { %v734_v48 = vpop.f32.mrb[10].mxu0 }
 0xc12   :  { %v738_v49 = vadd.f32 %v734_v48, %v213_v47  ;;  %v2375_v50 = vpop.f32.mrb[11].mxu0 }
 0xc14   :  { %2675 = vtanh.f32 %v738_v49  ;;  %v2165_v52 = vmul.f32 -1.442695, %v738_v49 }
 0xc16   :  { %2677 = vpow2.f32 %v2165_v52 }
 0xc1e   :  { %v2676_v51 = vpop.eup %2675 }
 0xc1f   :  { %748 = vrot.lane.b32.xlu1 %v2676_v51, %s2919_s17 }
 0xc20   :  { %v2678_v53 = vpop.eup %2677 }
 0xc21   :  { %v742_v54 = vadd.f32 1.0, %v2678_v53 }
 0xc23   :  { %2679 = vrcp.f32 %v742_v54 }
 0xc2d   :  { %v2680_v55 = vpop.eup %2679 }
 0xc2e   :  { %v746_v58 = vmul.f32 %v2680_v55, %v651_v42 }
 0xc91   :  { %v749_v56 = vpop.permute.xlu1 %748 }
 0xc92   :  { %v751_v57 = vmul.f32 %v2680_v55, %v749_v56  ;;  %v1094_v56 = vld [vmem:[#allocation9] sm:$0xff] }
 0xc94   :  { %753 = vrot.lane.b32.xlu0 %v751_v57, %s2920_s19  ;;  %v1095_v57 = vld [vmem:[#allocation9 + $0x8] sm:$0xff] }
 0xd06   :  { %v754_v59 = vpop.permute.xlu0 %753 }
 0xd07   :  { %v756_v60 = vadd.f32 %v754_v59, %v746_v58  ;;  %v3242_v58 = vpack.c.bf16 %v1095_v57, %v1094_v56  ;;  %v1096_v59 = vld [vmem:[#allocation9 + $0x10] sm:$0xff] }
 0xd09   :  { %2681 = vtanh.f32 %v756_v60 }
 0xd13   :  { %v2682_v61 = vpop.eup %2681 }
 0xd14   :  { %759 = vrot.lane.b32.xlu1 %v2682_v61, %s2919_s17 }
 0xd86   :  { %v760_v62 = vpop.permute.xlu1 %759 }
 0xd87   :  { %v762_v63 = vmul.f32 %v2680_v55, %v760_v62 }
 0xd89   :  { %764 = vrot.lane.b32.xlu0 %v762_v63, %s2920_s19 }
 0xdfb   :  { %v765_v2 = vpop.permute.xlu0 %764 }
 0xdfc   :  { %768 = vst.msk [vmem:[#allocation3 + $0x20] sm:$0xff] %vm101_vm1, %v765_v2  ;;  %2385 = vmatmul.mubr.msk.f32.vlgmr.msra.gmra.mrb[6].mxu1 %vm101_vm1, %v765_v2  ;;  %v1253_v2 = vld [vmem:[#allocation7 + $0x8] sm:$0xff] }
 0xdfd   :  { %2569 = vmatpush3.bf16.msra.mxu1 %v3058_v9  ;;  %2406 = vmatprep.mubr.msk.f32.mxu1 %vm2917_vm0, %v2918_v1 }
 0xdfe   :  { %2570 = vmatprep.subr.bf16.mxu1 %v2916_v0 }
 0xe01   :  { %2572 = vmatpush3.bf16.msra.mxu1 %v3071_v14 }
 0xe02   :  { %2581 = vmatprep.subr.bf16.mxu1 %v2916_v0 }
 0xe03   :  { %v1103_v34 = vld [vmem:[#allocation3 + $0x20] sm:$0xff] }
 0xecf   :  { %v839_v7 = vpop.f32.mrb[6].mxu1 }
 0xed0   :  { %v843_v8 = vadd.f32 %v839_v7, %v218_v4  ;;  %v2386_v10 = vpop.f32.mrb[7].mxu1  ;;  %v1251_v7 = vld [vmem:[#allocation4 + $0x8] sm:$0xff] }
 0xed1   :  { %v228_v10 = vadd.f32 %v3146_v5, %v3095_v17 }
 0xed2   :  { %2683 = vtanh.f32 %v843_v8  ;;  %v2167_v9 = vmul.f32 -1.442695, %v843_v8 }
 0xed4   :  { %2685 = vpow2.f32 %v2167_v9 }
 0xedc   :  { %v2684_v11 = vpop.eup %2683 }
 0xedd   :  { %853 = vrot.lane.b32.xlu1 %v2684_v11, %s2919_s17 }
 0xede   :  { %v2686_v12 = vpop.eup %2685 }
 0xedf   :  { %v847_v13 = vadd.f32 1.0, %v2686_v12 }
 0xee1   :  { %2687 = vrcp.f32 %v847_v13  ;;  %v3273_v13 = vld [vmem:[%s3453_s8] ss:$0 sm:$0xff]  ;;  %s2921_s8 = smov 96  }
 0xeeb   :  { %v2688_v15 = vpop.eup %2687 }
 0xeec   :  { %v851_v18 = vmul.f32 %v2688_v15, %v756_v60  ;;  %v1097_v60 = vld [vmem:[#allocation9 + $0x18] sm:$0xff] }
 0xeed   :  { %v3246_v61 = vpack.c.bf16 %v1097_v60, %v1096_v59 }
 0xf4f   :  { %v854_v16 = vpop.permute.xlu1 %853 }
 0xf50   :  { %v856_v14 = vmul.f32 %v2688_v15, %v854_v16 }
 0xf52   :  { %858 = vrot.lane.b32.xlu0 %v856_v14, %s2920_s19 }
 0xfc4   :  { %v859_v19 = vpop.permute.xlu0 %858 }
 0xfc5   :  { %v861_v3 = vadd.f32 %v859_v19, %v851_v18 }
 0xfc7   :  { %2689 = vtanh.f32 %v861_v3 }
 0xfd1   :  { %v2690_v23 = vpop.eup %2689 }
 0xfd2   :  { %864 = vrot.lane.b32.xlu1 %v2690_v23, %s2919_s17 }
0x1044   :  { %v865_v24 = vpop.permute.xlu1 %864 }
0x1045   :  { %v867_v25 = vmul.f32 %v2688_v15, %v865_v24 }
0x1047   :  { %869 = vrot.lane.b32.xlu0 %v867_v25, %s2920_s19 }
0x10b9   :  { %v870_v29 = vpop.permute.xlu0 %869 }
0x10ba   :  { %873 = vst.msk [vmem:[#allocation3 + $0x28] sm:$0xff] %vm101_vm1, %v870_v29  ;;  %2396 = vmatmul.mubr.msk.f32.vlgmr.msra.gmra.mrb[12].mxu0 %vm101_vm1, %v870_v29 }
0x10bb   :  { %2576 = vmatpush3.bf16.msra.mxu0 %v2573_v22  ;;  %2417 = vmatprep.mubr.msk.f32.mxu0 %vm101_vm1, %v1099_v30 }
0x10bc   :  { %2578 = vmatprep.subr.bf16.mxu0 %v2577_v28 }
0x10bf   :  { %2580 = vmatpush3.bf16.msra.mxu0 %v2577_v28 }
0x10c0   :  { %2593 = vmatprep.subr.bf16.mxu0 %v2916_v0 }
0x10c1   :  { %v1104_v35 = vld [vmem:[#allocation3 + $0x28] sm:$0xff] }
0x10c2   :  { %2418 = vmatmul.mubr.msk.f32.vlgmr.msra.gmra.mrb[14].mxu0 %vm101_vm1, %v1100_v31 }
0x10c3   :  { %2420 = vmatprep.mubr.msk.f32.mxu0 %vm101_vm1, %v1101_v32  ;;  %2595 = vmatpush3.bf16.msra.mxu0 %v3242_v58 }
0x10c4   :  { %2596 = vmatprep.subr.bf16.mxu0 %v2916_v0 }
0x10c6   :  { %2421 = vmatmul.mubr.msk.f32.gmra.mrb[16].mxu0 %vm101_vm1, %v1102_v33 }
0x10c7   :  { %2423 = vmatprep.mubr.msk.f32.mxu0 %vm101_vm1, %v1103_v34  ;;  %2598 = vmatpush3.bf16.msra.mxu0 %v3246_v61 }
0x10c8   :  { %2605 = vmatprep.subr.bf16.mxu0 %v2916_v0 }
0x10ca   :  { %2424 = vmatmul.mubr.msk.f32.gmra.mrb[18].mxu0 %vm101_vm1, %v1104_v35 }
0x118d   :  { %v944_v37 = vpop.f32.mrb[12].mxu0 }
0x118e   :  { %v948_v38 = vadd.f32 %v944_v37, %v223_v36  ;;  %v2397_v39 = vpop.f32.mrb[13].mxu0 }
0x1190   :  { %2691 = vtanh.f32 %v948_v38  ;;  %v2169_v47 = vmul.f32 -1.442695, %v948_v38 }
0x1192   :  { %2693 = vpow2.f32 %v2169_v47 }
0x1195   :  { %v3226_v40 = vpop.f32.mrb[14].mxu0 }
0x1196   :  { %v1203_v41 = vpop.f32.mrb[15].mxu0 }
0x1197   :  { %v1204_v15 = vadd.f32 %v3273_v13, %v1203_v41 }
0x1199   :  { %v3228_v42 = vpop.f32.mrb[16].mxu0 }
0x119a   :  { %v2692_v43 = vpop.eup %2691  ;;  %v3230_v44 = vpop.f32.mrb[17].mxu0 }
0x119b   :  { %958 = vrot.lane.b32.xlu1 %v2692_v43, %s2919_s17 }
0x119c   :  { %v2694_v6 = vpop.eup %2693 }
0x119d   :  { %v3233_v45 = vpop.f32.mrb[18].mxu0  ;;  %v952_v48 = vadd.f32 1.0, %v2694_v6 }
0x119e   :  { %v3235_v46 = vpop.f32.mrb[19].mxu0 }
0x119f   :  { %2695 = vrcp.f32 %v952_v48  ;;  %v1209_v48 = vadd.f32 %v3226_v40, %v3273_v13 }
0x11a9   :  { %v2696_v49 = vpop.eup %2695 }
0x11aa   :  { %v956_v52 = vmul.f32 %v2696_v49, %v861_v3 }
0x120d   :  { %v959_v50 = vpop.permute.xlu1 %958 }
0x120e   :  { %v961_v51 = vmul.f32 %v2696_v49, %v959_v50 }
0x1210   :  { %963 = vrot.lane.b32.xlu0 %v961_v51, %s2920_s19 }
0x1282   :  { %v964_v53 = vpop.permute.xlu0 %963 }
0x1283   :  { %v3238_v54 = vadd.f32 %v964_v53, %v956_v52 }
0x1285   :  { %2697 = vtanh.f32 %v3238_v54 }
0x128f   :  { %v2698_v55 = vpop.eup %2697 }
0x1290   :  { %969 = vrot.lane.b32.xlu1 %v2698_v55, %s2919_s17 }
0x1302   :  { %v970_v62 = vpop.permute.xlu1 %969 }
0x1303   :  { %v972_v63 = vmul.f32 %v2696_v49, %v970_v62 }
0x1305   :  { %974 = vrot.lane.b32.xlu0 %v972_v63, %s2920_s19 }
0x1309   :  { %1337 = vrot.lane.b32.xlu0 %v1253_v2, %s2920_s19 }
0x1377   :  { %v975_v4 = vpop.permute.xlu0 %974 }
0x1378   :  { %978 = vst.msk [vmem:[#allocation3 + $0x30] sm:$0xff] %vm101_vm1, %v975_v4  ;;  %2407 = vmatmul.mubr.msk.f32.vlgmr.msra.gmra.mrb[8].mxu1 %vm101_vm1, %v975_v4 }
0x1379   :  { %2583 = vmatpush3.bf16.msra.mxu1 %v3242_v58  ;;  %2437 = vmatprep.mubr.msk.f32.mxu1 %vm2917_vm0, %v2918_v1 }
0x137a   :  { %2584 = vmatprep.subr.bf16.mxu1 %v2916_v0 }
0x137b   :  { %v1338_v23 = vpop.permute.xlu0 %1337 }
0x137d   :  { %2586 = vmatpush3.bf16.msra.mxu1 %v3246_v61 }
0x137e   :  { %2587 = vmatprep.subr.bf16.mxu1 %v2916_v0 }
0x137f   :  { %v1105_v8 = vld [vmem:[#allocation3 + $0x30] sm:$0xff] }
0x1380   :  { %2438 = vmatmul.mubr.msk.f32.vlgmr.msra.gmra.mrb[10].mxu1 %vm101_vm1, %v1251_v7  ;;  %2426 = vmatprep.mubr.msk.f32.mxu0 %vm101_vm1, %v1105_v8 }
0x1381   :  { %2589 = vmatpush3.bf16.msra.mxu1 %v3242_v58  ;;  %2448 = vmatprep.mubr.msk.f32.mxu1 %vm2917_vm0, %v2918_v1 }
0x1382   :  { %2590 = vmatprep.subr.bf16.mxu1 %v2916_v0 }
0x1385   :  { %2592 = vmatpush3.bf16.msra.mxu1 %v3246_v61 }
0x1386   :  { %2599 = vmatprep.subr.bf16.mxu1 %v2916_v0 }
0x144b   :  { %v1049_v11 = vpop.f32.mrb[8].mxu1 }
0x144c   :  { %v1053_v9 = vadd.f32 %v1049_v11, %v228_v10  ;;  %v2408_v12 = vpop.f32.mrb[9].mxu1 }
0x144d   :  { %v1214_v12 = vadd.f32 %v3273_v13, %v3230_v44 }
0x144e   :  { %v2171_v29 = vmul.f32 -1.442695, %v1053_v9 }
0x1453   :  { %v1324_v16 = vpop.f32.mrb[10].mxu1 }
0x1454   :  { %v1328_v14 = vadd.f32 %v1324_v16, %v1204_v15  ;;  %v2439_v18 = vpop.f32.mrb[11].mxu1 }
0x1456   :  { %2699 = vtanh.f32 %v1328_v14  ;;  %v2182_v3 = vmul.f32 -1.442695, %v1328_v14 }
0x1458   :  { %2701 = vpow2.f32 %v2182_v3 }
0x1460   :  { %v2700_v19 = vpop.eup %2699 }
0x1461   :  { %1342 = vrot.lane.b32.xlu1 %v2700_v19, %s2919_s17 }
0x1462   :  { %v2702_v17 = vpop.eup %2701 }
0x1463   :  { %v1332_v5 = vadd.f32 1.0, %v2702_v17 }
0x1465   :  { %2703 = vrcp.f32 %v1332_v5 }
0x146f   :  { %v2704_v20 = vpop.eup %2703 }
0x1470   :  { %v1340_v24 = vmul.f32 %v2704_v20, %v1338_v23 }
0x14d3   :  { %v1343_v21 = vpop.permute.xlu1 %1342 }
0x14d4   :  { %v1345_v22 = vmul.f32 %v2704_v20, %v1343_v21 }
0x14d6   :  { %1347 = vrot.lane.b32.xlu1 %v1345_v22, %s2920_s19 }
0x1548   :  { %v1348_v25 = vpop.permute.xlu1 %1347 }
0x1549   :  { %v1350_v26 = vadd.f32 %v1348_v25, %v1340_v24 }
0x154b   :  { %2705 = vtanh.f32 %v1350_v26 }
0x154c   :  { %2707 = vtanh.f32 %v1053_v9 }
0x154d   :  { %2709 = vpow2.f32 %v2171_v29 }
0x1555   :  { %v2706_v27 = vpop.eup %2705 }
0x1556   :  { %1353 = vrot.lane.b32.xlu0 %v2706_v27, %s2919_s17  ;;  %v2708_v28 = vpop.eup %2707 }
0x1557   :  { %v2710_v30 = vpop.eup %2709 }
0x1558   :  { %v1057_v31 = vadd.f32 1.0, %v2710_v30 }
0x155a   :  { %1063 = vrot.lane.b32.xlu0 %v2708_v28, %s2919_s17  ;;  %2711 = vrcp.f32 %v1057_v31  ;;  %v1219_v28 = vadd.f32 %v3228_v42, %v3273_v13 }
0x1564   :  { %v2712_v34 = vpop.eup %2711 }
0x1565   :  { %v1061_v38 = vmul.f32 %v2712_v34, %v3238_v54 }
0x15c8   :  { %v1354_v32 = vpop.permute.xlu0 %1353 }
0x15c9   :  { %v1356_v33 = vmul.f32 %v2704_v20, %v1354_v32 }
0x15cb   :  { %1358 = vrot.lane.b32.xlu1 %v1356_v33, %s2920_s19 }
0x15cc   :  { %v1064_v35 = vpop.permute.xlu0 %1063 }
0x15cd   :  { %v1066_v36 = vmul.f32 %v2712_v34, %v1064_v35 }
0x15cf   :  { %1068 = vrot.lane.b32.xlu0 %v1066_v36, %s2920_s19 }
0x163d   :  { %v1359_v37 = vpop.permute.xlu1 %1358 }
0x163e   :  { %1361 = vst.msk [vmem:[#allocation10] sm:$0xff] %vm101_vm1, %v1359_v37  ;;  %2449 = vmatmul.mubr.msk.f32.vlgmr.msra.gmra.mrb[12].mxu1 %vm101_vm1, %v1359_v37 }
0x163f   :  { %2601 = vmatpush3.bf16.msra.mxu1 %v3242_v58  ;;  %2470 = vmatprep.mubr.msk.f32.mxu1 %vm2917_vm0, %v2918_v1 }
0x1640   :  { %2602 = vmatprep.subr.bf16.mxu1 %v2916_v0 }
0x1641   :  { %v1069_v39 = vpop.permute.xlu0 %1068 }
0x1642   :  { %v3289_v41 = vadd.f32 %v1069_v39, %v1061_v38 }
0x1643   :  { %2604 = vmatpush3.bf16.msra.mxu1 %v3246_v61 }
0x1644   :  { %2713 = vtanh.f32 %v3289_v41  ;;  %2611 = vmatprep.subr.bf16.mxu1 %v2916_v0 }
0x164e   :  { %v2714_v43 = vpop.eup %2713 }
0x164f   :  { %1074 = vrot.lane.b32.xlu0 %v2714_v43, %s2919_s17 }
0x16c1   :  { %v1075_v47 = vpop.permute.xlu0 %1074 }
0x16c2   :  { %v1077_v6 = vmul.f32 %v2712_v34, %v1075_v47 }
0x16c4   :  { %1079 = vrot.lane.b32.xlu0 %v1077_v6, %s2920_s19 }
0x1711   :  { %v1431_v49 = vpop.f32.mrb[12].mxu1 }
0x1712   :  { %v1435_v50 = vadd.f32 %v1431_v49, %v1209_v48  ;;  %v2450_v51 = vpop.f32.mrb[13].mxu1 }
0x1714   :  { %2715 = vtanh.f32 %v1435_v50  ;;  %v2184_v55 = vmul.f32 -1.442695, %v1435_v50  ;;  %v1224_v50 = vadd.f32 %v3273_v13, %v3235_v46 }
0x1716   :  { %2717 = vpow2.f32 %v2184_v55 }
0x171e   :  { %v2716_v52 = vpop.eup %2715 }
0x171f   :  { %1445 = vrot.lane.b32.xlu1 %v2716_v52, %s2919_s17 }
0x1720   :  { %v2718_v40 = vpop.eup %2717 }
0x1721   :  { %v1439_v56 = vadd.f32 1.0, %v2718_v40 }
0x1723   :  { %2719 = vrcp.f32 %v1439_v56 }
0x172d   :  { %v2720_v57 = vpop.eup %2719 }
0x172e   :  { %v1443_v62 = vmul.f32 %v2720_v57, %v1350_v26 }
0x1736   :  { %v1080_v53 = vpop.permute.xlu0 %1079 }
0x1737   :  { %1083 = vst.msk [vmem:[#allocation3 + $0x38] sm:$0xff] %vm101_vm1, %v1080_v53  ;;  %1084 = vst.msk [vmem:[#allocation11] sm:$0xff] %vm101_vm1, %v1080_v53 }
0x173e   :  { %v1106_v54 = vld [vmem:[#allocation3 + $0x38] sm:$0xff] }
0x173f   :  { %2427 = vmatmul.mubr.msk.f32.gmra.mrb[20].mxu0 %vm101_vm1, %v1106_v54 }
0x1740   :  { %2459 = vmatprep.mubr.msk.f32.mxu0 %vm2917_vm0, %v2918_v1 }
0x1791   :  { %v1446_v59 = vpop.permute.xlu1 %1445 }
0x1792   :  { %v1448_v60 = vmul.f32 %v2720_v57, %v1446_v59 }
0x1794   :  { %1450 = vrot.lane.b32.xlu1 %v1448_v60, %s2920_s19 }
0x1806   :  { %v1451_v63 = vpop.permute.xlu1 %1450 }
0x1807   :  { %v1453_v2 = vadd.f32 %v1451_v63, %v1443_v62 }
0x1809   :  { %2721 = vtanh.f32 %v1453_v2 }
0x1812   :  { %v3305_v4 = vpop.f32.mrb[20].mxu0 }
0x1813   :  { %v2722_v7 = vpop.eup %2721  ;;  %v3307_v8 = vpop.f32.mrb[21].mxu0 }
0x1814   :  { %1456 = vrot.lane.b32.xlu1 %v2722_v7, %s2919_s17 }
0x1886   :  { %v1457_v10 = vpop.permute.xlu1 %1456 }
0x1887   :  { %v1459_v11 = vmul.f32 %v2720_v57, %v1457_v10 }
0x1889   :  { %1461 = vrot.lane.b32.xlu1 %v1459_v11, %s2920_s19 }
0x18fb   :  { %v1462_v9 = vpop.permute.xlu1 %1461 }
0x18fc   :  { %1465 = vst.msk [vmem:[#allocation10 + $0x8] sm:$0xff] %vm101_vm1, %v1462_v9  ;;  %2460 = vmatmul.mubr.msk.f32.vlgmr.msra.gmra.mrb[22].mxu0 %vm101_vm1, %v1462_v9  ;;  %v1229_v9 = vadd.f32 %v3233_v45, %v3273_v13 }
0x18fd   :  { %2607 = vmatpush3.bf16.msra.mxu0 %v3242_v58  ;;  %2481 = vmatprep.mubr.msk.f32.mxu0 %vm2917_vm0, %v2918_v1 }
0x18fe   :  { %2608 = vmatprep.subr.bf16.mxu0 %v2916_v0 }
0x1901   :  { %2610 = vmatpush3.bf16.msra.mxu0 %v3246_v61 }
0x1902   :  { %2617 = vmatprep.subr.bf16.mxu0 %v2916_v0 }
0x19cf   :  { %v1535_v15 = vpop.f32.mrb[22].mxu0 }
0x19d0   :  { %v1539_v16 = vadd.f32 %v1535_v15, %v1214_v12  ;;  %v2461_v14 = vpop.f32.mrb[23].mxu0 }
0x19d2   :  { %2723 = vtanh.f32 %v1539_v16  ;;  %v2186_v19 = vmul.f32 -1.442695, %v1539_v16 }
0x19d4   :  { %2725 = vpow2.f32 %v2186_v19 }
0x19dc   :  { %v2724_v18 = vpop.eup %2723 }
0x19dd   :  { %1549 = vrot.lane.b32.xlu0 %v2724_v18, %s2919_s17 }
0x19de   :  { %v2726_v3 = vpop.eup %2725 }
0x19df   :  { %v1543_v17 = vadd.f32 1.0, %v2726_v3 }
0x19e1   :  { %2727 = vrcp.f32 %v1543_v17 }
0x19eb   :  { %v2728_v5 = vpop.eup %2727 }
0x19ec   :  { %v1547_v22 = vmul.f32 %v2728_v5, %v1453_v2 }
0x1a4f   :  { %v1550_v20 = vpop.permute.xlu0 %1549 }
0x1a50   :  { %v1552_v21 = vmul.f32 %v2728_v5, %v1550_v20 }
0x1a52   :  { %1554 = vrot.lane.b32.xlu1 %v1552_v21, %s2920_s19 }
0x1ac4   :  { %v1555_v23 = vpop.permute.xlu1 %1554 }
0x1ac5   :  { %v1557_v44 = vadd.f32 %v1555_v23, %v1547_v22  ;;  %v1234_v23 = vadd.f32 %v3273_v13, %v3307_v8 }
0x1ac7   :  { %2729 = vtanh.f32 %v1557_v44 }
0x1ad1   :  { %v2730_v24 = vpop.eup %2729 }
0x1ad2   :  { %1560 = vrot.lane.b32.xlu0 %v2730_v24, %s2919_s17 }
0x1b44   :  { %v1561_v25 = vpop.permute.xlu0 %1560 }
0x1b45   :  { %v1563_v26 = vmul.f32 %v2728_v5, %v1561_v25 }
0x1b47   :  { %1565 = vrot.lane.b32.xlu1 %v1563_v26, %s2920_s19 }
0x1bb9   :  { %v1566_v27 = vpop.permute.xlu1 %1565 }
0x1bba   :  { %1569 = vst.msk [vmem:[#allocation10 + $0x10] sm:$0xff] %vm101_vm1, %v1566_v27  ;;  %2471 = vmatmul.mubr.msk.f32.vlgmr.msra.gmra.mrb[14].mxu1 %vm101_vm1, %v1566_v27 }
0x1bbb   :  { %2613 = vmatpush3.bf16.msra.mxu1 %v3242_v58  ;;  %2492 = vmatprep.mubr.msk.f32.mxu1 %vm2917_vm0, %v2918_v1 }
0x1bbc   :  { %2614 = vmatprep.subr.bf16.mxu1 %v2916_v0 }
0x1bbf   :  { %2616 = vmatpush3.bf16.msra.mxu1 %v3246_v61 }
0x1bc0   :  { %2623 = vmatprep.subr.bf16.mxu1 %v2916_v0 }
0x1c8d   :  { %v1639_v29 = vpop.f32.mrb[14].mxu1 }
0x1c8e   :  { %v1643_v30 = vadd.f32 %v1639_v29, %v1219_v28  ;;  %v2472_v31 = vpop.f32.mrb[15].mxu1 }
0x1c90   :  { %2731 = vtanh.f32 %v1643_v30  ;;  %v2188_v33 = vmul.f32 -1.442695, %v1643_v30 }
0x1c92   :  { %2733 = vpow2.f32 %v2188_v33 }
0x1c9a   :  { %v2732_v32 = vpop.eup %2731 }
0x1c9b   :  { %1653 = vrot.lane.b32.xlu0 %v2732_v32, %s2919_s17 }
0x1c9c   :  { %v2734_v34 = vpop.eup %2733 }
0x1c9d   :  { %v1647_v35 = vadd.f32 1.0, %v2734_v34 }
0x1c9f   :  { %2735 = vrcp.f32 %v1647_v35 }
0x1ca9   :  { %v2736_v36 = vpop.eup %2735 }
0x1caa   :  { %v1651_v39 = vmul.f32 %v2736_v36, %v1557_v44 }
0x1d0d   :  { %v1654_v37 = vpop.permute.xlu0 %1653 }
0x1d0e   :  { %v1656_v38 = vmul.f32 %v2736_v36, %v1654_v37 }
0x1d10   :  { %1658 = vrot.lane.b32.xlu1 %v1656_v38, %s2920_s19 }
0x1d82   :  { %v1659_v43 = vpop.permute.xlu1 %1658 }
0x1d83   :  { %v1661_v42 = vadd.f32 %v1659_v43, %v1651_v39  ;;  %v1239_v39 = vadd.f32 %v3305_v4, %v3273_v13 }
0x1d85   :  { %2737 = vtanh.f32 %v1661_v42 }
0x1d8f   :  { %v2738_v47 = vpop.eup %2737 }
0x1d90   :  { %1664 = vrot.lane.b32.xlu0 %v2738_v47, %s2919_s17 }
0x1e02   :  { %v1665_v6 = vpop.permute.xlu0 %1664 }
0x1e03   :  { %v1667_v48 = vmul.f32 %v2736_v36, %v1665_v6 }
0x1e05   :  { %1669 = vrot.lane.b32.xlu1 %v1667_v48, %s2920_s19 }
0x1e77   :  { %v1670_v49 = vpop.permute.xlu1 %1669 }
0x1e78   :  { %1673 = vst.msk [vmem:[#allocation10 + $0x18] sm:$0xff] %vm101_vm1, %v1670_v49  ;;  %2482 = vmatmul.mubr.msk.f32.vlgmr.msra.gmra.mrb[24].mxu0 %vm101_vm1, %v1670_v49 }
0x1e79   :  { %2619 = vmatpush3.bf16.msra.mxu0 %v3242_v58  ;;  %2503 = vmatprep.mubr.msk.f32.mxu0 %vm2917_vm0, %v2918_v1 }
0x1e7a   :  { %2620 = vmatprep.subr.bf16.mxu0 %v2916_v0 }
0x1e7d   :  { %2622 = vmatpush3.bf16.msra.mxu0 %v3246_v61 }
0x1f4b   :  { %v1743_v51 = vpop.f32.mrb[24].mxu0 }
0x1f4c   :  { %v1747_v52 = vadd.f32 %v1743_v51, %v1224_v50  ;;  %v2483_v53 = vpop.f32.mrb[25].mxu0 }
0x1f4e   :  { %2739 = vtanh.f32 %v1747_v52  ;;  %v2190_v55 = vmul.f32 -1.442695, %v1747_v52 }
0x1f50   :  { %2741 = vpow2.f32 %v2190_v55 }
0x1f58   :  { %v2740_v54 = vpop.eup %2739 }
0x1f59   :  { %1757 = vrot.lane.b32.xlu0 %v2740_v54, %s2919_s17 }
0x1f5a   :  { %v2742_v40 = vpop.eup %2741 }
0x1f5b   :  { %v1751_v56 = vadd.f32 1.0, %v2742_v40 }
0x1f5d   :  { %2743 = vrcp.f32 %v1751_v56 }
0x1f67   :  { %v2744_v57 = vpop.eup %2743 }
0x1f68   :  { %v1755_v62 = vmul.f32 %v2744_v57, %v1661_v42 }
0x1fcb   :  { %v1758_v59 = vpop.permute.xlu0 %1757 }
0x1fcc   :  { %v1760_v60 = vmul.f32 %v2744_v57, %v1758_v59 }
0x1fce   :  { %1762 = vrot.lane.b32.xlu1 %v1760_v60, %s2920_s19 }
0x2040   :  { %v1763_v63 = vpop.permute.xlu1 %1762 }
0x2041   :  { %v1765_v46 = vadd.f32 %v1763_v63, %v1755_v62 }
0x2043   :  { %2745 = vtanh.f32 %v1765_v46 }
0x204d   :  { %v2746_v2 = vpop.eup %2745 }
0x204e   :  { %1768 = vrot.lane.b32.xlu0 %v2746_v2, %s2919_s17 }
0x20c0   :  { %v1769_v7 = vpop.permute.xlu0 %1768 }
0x20c1   :  { %v1771_v10 = vmul.f32 %v2744_v57, %v1769_v7 }
0x20c3   :  { %1773 = vrot.lane.b32.xlu1 %v1771_v10, %s2920_s19 }
0x2135   :  { %v1774_v11 = vpop.permute.xlu1 %1773 }
0x2136   :  { %1777 = vst.msk [vmem:[#allocation10 + $0x20] sm:$0xff] %vm101_vm1, %v1774_v11  ;;  %2493 = vmatmul.mubr.msk.f32.vlgmr.msra.gmra.mrb[16].mxu1 %vm101_vm1, %v1774_v11 }
0x2137   :  { %2625 = vmatpush3.bf16.msra.mxu1 %v3242_v58  ;;  %2514 = vmatprep.mubr.msk.f32.mxu1 %vm2917_vm0, %v2918_v1 }
0x2138   :  { %2626 = vmatprep.subr.bf16.mxu1 %v2916_v0 }
0x213b   :  { %2628 = vmatpush3.bf16.msra.mxu1 %v3246_v61 }
0x2209   :  { %v1847_v12 = vpop.f32.mrb[16].mxu1 }
0x220a   :  { %v1851_v15 = vadd.f32 %v1847_v12, %v1229_v9  ;;  %v2494_v16 = vpop.f32.mrb[17].mxu1 }
0x220c   :  { %2747 = vtanh.f32 %v1851_v15  ;;  %v2192_v18 = vmul.f32 -1.442695, %v1851_v15 }
0x220e   :  { %2749 = vpow2.f32 %v2192_v18 }
0x2216   :  { %v2748_v14 = vpop.eup %2747 }
0x2217   :  { %1861 = vrot.lane.b32.xlu0 %v2748_v14, %s2919_s17 }
0x2218   :  { %v2750_v58 = vpop.eup %2749 }
0x2219   :  { %v1855_v19 = vadd.f32 1.0, %v2750_v58 }
0x221b   :  { %2751 = vrcp.f32 %v1855_v19 }
0x2225   :  { %v2752_v1 = vpop.eup %2751 }
0x2226   :  { %v1859_v61 = vmul.f32 %v2752_v1, %v1765_v46 }
0x2289   :  { %v1862_v3 = vpop.permute.xlu0 %1861 }
0x228a   :  { %v1864_v0 = vmul.f32 %v2752_v1, %v1862_v3 }
0x228c   :  { %1866 = vrot.lane.b32.xlu1 %v1864_v0, %s2920_s19 }
0x22fe   :  { %v1867_v17 = vpop.permute.xlu1 %1866 }
0x22ff   :  { %v1869_v45 = vadd.f32 %v1867_v17, %v1859_v61 }
0x2301   :  { %2753 = vtanh.f32 %v1869_v45 }
0x230b   :  { %v2754_v5 = vpop.eup %2753 }
0x230c   :  { %1872 = vrot.lane.b32.xlu0 %v2754_v5, %s2919_s17 }
0x237e   :  { %v1873_v20 = vpop.permute.xlu0 %1872 }
0x237f   :  { %v1875_v21 = vmul.f32 %v2752_v1, %v1873_v20 }
0x2381   :  { %1877 = vrot.lane.b32.xlu1 %v1875_v21, %s2920_s19 }
0x23f3   :  { %v1878_v22 = vpop.permute.xlu1 %1877 }
0x23f4   :  { %1881 = vst.msk [vmem:[#allocation10 + $0x28] sm:$0xff] %vm101_vm1, %v1878_v22  ;;  %2504 = vmatmul.mubr.msk.f32.vlgmr.msra.gmra.mrb[26].mxu0 %vm101_vm1, %v1878_v22 }
0x24c7   :  { %v1951_v44 = vpop.f32.mrb[26].mxu0 }
0x24c8   :  { %v1955_v24 = vadd.f32 %v1951_v44, %v1234_v23  ;;  %v2505_v25 = vpop.f32.mrb[27].mxu0 }
0x24ca   :  { %2755 = vtanh.f32 %v1955_v24  ;;  %v2194_v27 = vmul.f32 -1.442695, %v1955_v24 }
0x24cc   :  { %2757 = vpow2.f32 %v2194_v27 }
0x24d4   :  { %v2756_v26 = vpop.eup %2755 }
0x24d5   :  { %1965 = vrot.lane.b32.xlu0 %v2756_v26, %s2919_s17 }
0x24d6   :  { %v2758_v28 = vpop.eup %2757 }
0x24d7   :  { %v1959_v29 = vadd.f32 1.0, %v2758_v28 }
0x24d9   :  { %2759 = vrcp.f32 %v1959_v29 }
0x24e3   :  { %v2760_v30 = vpop.eup %2759 }
0x24e4   :  { %v1963_v33 = vmul.f32 %v2760_v30, %v1869_v45 }
0x2547   :  { %v1966_v31 = vpop.permute.xlu0 %1965 }
0x2548   :  { %v1968_v32 = vmul.f32 %v2760_v30, %v1966_v31 }
0x254a   :  { %1970 = vrot.lane.b32.xlu1 %v1968_v32, %s2920_s19 }
0x25bc   :  { %v1971_v34 = vpop.permute.xlu1 %1970 }
0x25bd   :  { %v1973_v8 = vadd.f32 %v1971_v34, %v1963_v33 }
0x25bf   :  { %2761 = vtanh.f32 %v1973_v8 }
0x25c9   :  { %v2762_v35 = vpop.eup %2761 }
0x25ca   :  { %1976 = vrot.lane.b32.xlu0 %v2762_v35, %s2919_s17 }
0x263c   :  { %v1977_v36 = vpop.permute.xlu0 %1976 }
0x263d   :  { %v1979_v37 = vmul.f32 %v2760_v30, %v1977_v36 }
0x263f   :  { %1981 = vrot.lane.b32.xlu1 %v1979_v37, %s2920_s19 }
0x26b1   :  { %v1982_v38 = vpop.permute.xlu1 %1981 }
0x26b2   :  { %1985 = vst.msk [vmem:[#allocation10 + $0x30] sm:$0xff] %vm101_vm1, %v1982_v38  ;;  %2515 = vmatmul.mubr.msk.f32.vlgmr.msra.gmra.mrb[18].mxu1 %vm101_vm1, %v1982_v38 }
0x2785   :  { %v2055_v43 = vpop.f32.mrb[18].mxu1 }
0x2786   :  { %v2059_v42 = vadd.f32 %v2055_v43, %v1239_v39  ;;  %v2516_v47 = vpop.f32.mrb[19].mxu1 }
0x2788   :  { %2763 = vtanh.f32 %v2059_v42  ;;  %v2196_v48 = vmul.f32 -1.442695, %v2059_v42 }
0x278a   :  { %2765 = vpow2.f32 %v2196_v48 }
0x2792   :  { %v2764_v6 = vpop.eup %2763 }
0x2793   :  { %2069 = vrot.lane.b32.xlu0 %v2764_v6, %s2919_s17 }
0x2794   :  { %v2766_v49 = vpop.eup %2765 }
0x2795   :  { %v2063_v50 = vadd.f32 1.0, %v2766_v49 }
0x2797   :  { %2767 = vrcp.f32 %v2063_v50 }
0x27a1   :  { %v2768_v51 = vpop.eup %2767 }
0x27a2   :  { %v2067_v54 = vmul.f32 %v2768_v51, %v1973_v8 }
0x2805   :  { %v2070_v52 = vpop.permute.xlu0 %2069 }
0x2806   :  { %v2072_v53 = vmul.f32 %v2768_v51, %v2070_v52 }
0x2808   :  { %2074 = vrot.lane.b32.xlu1 %v2072_v53, %s2920_s19 }
0x287a   :  { %v2075_v55 = vpop.permute.xlu1 %2074 }
0x287b   :  { %v2077_v13 = vadd.f32 %v2075_v55, %v2067_v54 }
0x287d   :  { %2769 = vtanh.f32 %v2077_v13 }
0x2887   :  { %v2770_v4 = vpop.eup %2769 }
0x2888   :  { %2080 = vrot.lane.b32.xlu0 %v2770_v4, %s2919_s17  ;;  %s2837_s17 = scalar_lea.vmem %s2116_s5, 256 }
0x2889   :  { %p2838_p10 = scmp.ne.s32.totalorder %s2116_s5, %s2837_s17  ;;  %p2843_p12 = scmp.lt.s32.totalorder %s2837_s17, %s2837_s17 }
0x288b   :  { %p2844_p13 = por %p2843_p12, %p2842_p11 }
0x288c   :  { %1086 = vrot.lane.b32.xlu0 %v3289_v41, %s2921_s8 }
0x288d   :  { %p2845_p0 = pnand %p2844_p13, %p2838_p10 }
0x28fa   :  { %v2081_v40 = vpop.permute.xlu0 %2080 }
0x28fb   :  { %v2083_v56 = vmul.f32 %v2768_v51, %v2081_v40 }
0x28fd   :  { %2085 = vrot.lane.b32.xlu1 %v2083_v56, %s2920_s19 }
0x28fe   :  { %v1087_v57 = vpop.permute.xlu0 %1086 }
0x28ff   :  { %1089 = vst.msk [vmem:[#allocation13] sm:$0xff] %vm101_vm1, %v1087_v57 }
0x2901   :  { %2093 = vrot.lane.b32.xlu1 %v2077_v13, %s2921_s8 }
0x296f   :  { %v2086_v59 = vpop.permute.xlu1 %2085 }
0x2970   :  { %2089 = vst.msk [vmem:[#allocation10 + $0x38] sm:$0xff] %vm101_vm1, %v2086_v59  ;;  %2091 = vst.msk [vmem:[#allocation11 + $0x8] sm:$0xff] %vm101_vm1, %v2086_v59 }
0x2971   :  { %2848 = shalt.err (!%p2845_p0)
}
0x2972   :  { %s2849_s18 = scalar_lea.hbm %s3455_s10, 256 }
0x2973   :  { %p2850_p1 = scmp.ne.s32.totalorder %s3455_s10, %s2849_s18  ;;  %p2853_p2 = scmp.lt.u32.totalorder %s2849_s18, %s3455_s10 }
0x2975   :  { %p2855_p3 = pnand %p2853_p2, %p2850_p1 }
0x2977   :  { %2858 = shalt.err (!%p2855_p3)
}
0x2978   :  { %2121 = dma.vmem_to_hbm [thread:$0]  %s2116_s5, 256, %s3455_s10, [#allocation12], %s2913_s29, %s2913_s29, %s2914_s30  }
0x2979   :  { %s2859_s12 = scalar_lea.vmem %s3383_s22, 1024  ;;  %p2864_p5 = scmp.lt.s32.totalorder %s3383_s22, %s3383_s22 }
0x297a   :  { %p2860_p4 = scmp.ne.s32.totalorder %s3383_s22, %s2859_s12  ;;  %p2865_p6 = scmp.lt.s32.totalorder %s2859_s12, %s2859_s12 }
0x297c   :  { %p2866_p7 = por %p2865_p6, %p2864_p5 }
0x297e   :  { %p2867_p8 = pnand %p2866_p7, %p2860_p4 }
0x2980   :  { %2870 = shalt.err (!%p2867_p8)
}
0x2981   :  { %s2871_s15 = scalar_lea.hbm %s3454_s9, 1024 }
0x2982   :  { %p2872_p9 = scmp.ne.s32.totalorder %s3454_s9, %s2871_s15  ;;  %p2875_p10 = scmp.lt.u32.totalorder %s2871_s15, %s3454_s9 }
0x2984   :  { %p2877_p11 = pnand %p2875_p10, %p2872_p9 }
0x2986   :  { %2880 = shalt.err (!%p2877_p11)
}
0x2987   :  { %2109 = dma.vmem_to_hbm [thread:$0]  %s3383_s22, 1024, %s3454_s9, [#allocation6], %s2913_s29, %s2913_s29, %s2914_s30   ;;  %v2094_v41 = vpop.permute.xlu1 %2093 }
0x2988   :  { %2097 = vst.msk [vmem:[#allocation13 + $0x8] sm:$0xff] %vm101_vm1, %v2094_v41  ;;  %s2881_s8 = scalar_lea.vmem %s3387_s23, 256  ;;  %p2886_p13 = scmp.lt.s32.totalorder %s3387_s23, %s3387_s23 }
0x2989   :  { %p2882_p12 = scmp.ne.s32.totalorder %s3387_s23, %s2881_s8  ;;  %p2887_p0 = scmp.lt.s32.totalorder %s2881_s8, %s2881_s8 }
0x298b   :  { %p2888_p1 = por %p2887_p0, %p2886_p13 }
0x298d   :  { %p2889_p2 = pnand %p2888_p1, %p2882_p12 }
0x298f   :  { %2892 = shalt.err (!%p2889_p2)
}
0x2990   :  { %s2893_s21 = scalar_lea.hbm %s3456_s11, 256 }
0x2991   :  { %p2894_p3 = scmp.ne.s32.totalorder %s3456_s11, %s2893_s21  ;;  %p2897_p4 = scmp.lt.u32.totalorder %s2893_s21, %s3456_s11 }
0x2993   :  { %p2899_p5 = pnand %p2897_p4, %p2894_p3 }
0x2995   :  { %2902 = shalt.err (!%p2899_p5)
}
0x2996   :  { %2133 = dma.vmem_to_hbm [thread:$0]  %s3387_s23, 256, %s3456_s11, [#allocation12], %s2913_s29, %s2913_s29, %s2914_s30  }
0x2997   :  { %2907 = dma.done.wait [#allocation6], 1024  }
0x2998   :  { %2908 = vsyncadd [#allocation6], 4294966272 }
0x2999   :  { %2909 = dma.done.wait [#allocation12], 512  }
0x299a   :  { %2910 = vsyncadd [#allocation12], 4294966784 }
0x299b   :  { %2143 = vsyncpa [#allocation5], 1 }
0x299c   :  { %2144 = vsyncpa [#allocation8], 1 }
0x299d   :  { %2145 = vsyncpa [#allocation6], 1 }
0x299e   :  { %2146 = vsyncpa [#allocation12], 1 }

</bundles_post_ra>
